<compile_context>
chip_gen: v7x
topology: tpu7x:2x2x1
jax: 0.10.0
libtpu: 0.0.40
codegen_flags: <defaults>
</compile_context>

<pallas_src>
import functools
import math

import jax
import jax.numpy as jnp
from jax import lax
from jax.experimental import pallas as pl
from jax.experimental.pallas import tpu as pltpu

NEG_INF = -1e30  # additive pre-softmax mask constant (f32)

# ----------------------------------------------------------------------------
# packed-parameter layout (indices shared by pack_params and the kernel)
# ----------------------------------------------------------------------------
# vec_d rows ((1, d) biases / LayerNorm params stacked into one (VD_ROWS, d)):
VD_LIN_B, VD_CONV1_B, VD_CONV2_B = 0, 1, 2
VD_TCN_BQ, VD_TCN_BK, VD_TCN_BV = 3, 4, 5
VD_SGNN_B = 6
VD_ENC_BASE, VD_ENC_STRIDE, N_ENC_LAYERS = 7, 9, 2
# per encoder layer: +0 bq, +1 bk, +2 bv, +3 bo, +4 ln1_g, +5 ln1_b,
#                    +6 b2, +7 ln2_g, +8 ln2_b
VD_DEC_BASE = VD_ENC_BASE + N_ENC_LAYERS * VD_ENC_STRIDE          # 25
# decoder: +0 self_bv, +1 self_bo, +2 ln1_g, +3 ln1_b, +4 cross_bq, +5 cross_bk,
#          +6 cross_bv, +7 cross_bo, +8 ln2_g, +9 ln2_b, +10 b2, +11 ln3_g,
#          +12 ln3_b
VD_ROWS = VD_DEC_BASE + 13                                        # 38

# qkv_w stack (each (d, 3d)):
QKV_TCN, QKV_ENC0, QKV_ENC1, QKV_DEC_CROSS = 0, 1, 2, 3
# sq_w stack (each (d, d)):
(SQ_SGNN, SQ_ENC0_WO, SQ_ENC1_WO,
 SQ_DEC_SELF_WV, SQ_DEC_SELF_WO, SQ_DEC_CROSS_WO) = range(6)
# w1 / w2 / vec_ffn stacks:
FFN_ENC0, FFN_ENC1, FFN_DEC = 0, 1, 2


# ----------------------------------------------------------------------------
# the fused kernel (one grid step == one batch sequence)
# ----------------------------------------------------------------------------
def _st_encoder_kernel(x_ref, pe_ref, lin_w_ref, conv_w_ref, qkv_w_ref,
                       sq_w_ref, w1_ref, w2_ref, vd_ref, vf_ref, o_ref,
                       *, d, scale, mxu_dtype):
    W = x_ref.shape[1]

    def mm(a, b):  # MXU matmul, bf16 (or f32) inputs, f32 accumulation
        return jnp.dot(a.astype(mxu_dtype), b.astype(mxu_dtype),
                       preferred_element_type=jnp.float32)

    def qkt(a, b):  # a @ b^T by contracting last dims (no materialized k^T)
        return lax.dot_general(a.astype(mxu_dtype), b.astype(mxu_dtype),
                               (((1,), (1,)), ((), ())),
                               preferred_element_type=jnp.float32)

    def softmax(s):  # exact divide (review: avoid approx-reciprocal error)
        p = jnp.exp(s - jnp.max(s, axis=-1, keepdims=True))
        return p / jnp.sum(p, axis=-1, keepdims=True)

    def row(i):  # (1, d) bias / LN row from the packed stack
        return vd_ref[i:i + 1, :]

    def layernorm(h, gi, bi, eps=1e-5):
        mu_ = jnp.mean(h, axis=-1, keepdims=True)
        var = jnp.mean((h - mu_) * (h - mu_), axis=-1, keepdims=True)
        return (h - mu_) * lax.rsqrt(var + eps) * row(gi) + row(bi)

    def shift1(h):
        # causal shift within the sequence: out[t] = h[t-1], out[0] = 0.
        # In-register sublane shift (zero row + slice concat) -- replaces the
        # old (B*W)x(B*W) shift-matrix matmul / HBM shift matrix entirely.
        return jnp.concatenate(
            [jnp.zeros((1, h.shape[1]), h.dtype), h[:-1, :]], axis=0)

    def attend(q, k, v, mask=None):
        s = qkt(q, k) * scale
        if mask is not None:
            s = s + mask
        return mm(softmax(s), v)

    def qkv_proj(inp, w_idx, b_base):
        qkv = mm(inp, qkv_w_ref[w_idx])          # one MXU op, N = 3d
        q = qkv[:, 0 * d:1 * d] + row(b_base + 0)
        k = qkv[:, 1 * d:2 * d] + row(b_base + 1)
        v = qkv[:, 2 * d:3 * d] + row(b_base + 2)
        return q, k, v

    x = x_ref[0]                                  # (W, n_features)

    # in-kernel causal mask (iota compares; no HBM mask traffic)
    r_idx = lax.broadcasted_iota(jnp.int32, (W, W), 0)
    c_idx = lax.broadcasted_iota(jnp.int32, (W, W), 1)
    causal = jnp.where(c_idx <= r_idx, 0.0, NEG_INF)

    # 1) input Linear + ReLU
    h = jnp.maximum(mm(x, lin_w_ref[...]) + row(VD_LIN_B), 0.0)      # (W, d)

    # 2) TCN block: two kernel_size=2 causal convs (packed [prev; cur] taps),
    #    residual ReLU
    c1 = jnp.maximum(
        mm(jnp.concatenate([shift1(h), h], axis=1), conv_w_ref[0])
        + row(VD_CONV1_B), 0.0)
    c2 = jnp.maximum(
        mm(jnp.concatenate([shift1(c1), c1], axis=1), conv_w_ref[1])
        + row(VD_CONV2_B), 0.0)
    tcn_res = jnp.maximum(c2 + h, 0.0)

    # 3) TCN causal self-attention with residual (attention=True branch)
    q, k, v = qkv_proj(tcn_res, QKV_TCN, VD_TCN_BQ)
    tcn = tcn_res + attend(q, k, v, causal)

    # 4) gate: tanh(x_b) * sigmoid(x_a); x_a == x_b (tcna applied once)
    g = jnp.tanh(tcn) * jax.nn.sigmoid(tcn)

    # 5) SGNN: softmax-similarity adjacency aggregation + dense ReLU
    adj = softmax(qkt(g, g) * scale)
    sg = jnp.maximum(mm(mm(adj, g), sq_w_ref[SQ_SGNN]) + row(VD_SGNN_B), 0.0)

    # 6) + positional encoding
    z = sg + pe_ref[...]

    # 7) two fused TransformerEncoderLayers (post-norm, ReLU FFN, nhead=1)
    for l in range(N_ENC_LAYERS):
        base = VD_ENC_BASE + l * VD_ENC_STRIDE
        q, k, v = qkv_proj(z, QKV_ENC0 + l, base + 0)
        a = mm(attend(q, k, v), sq_w_ref[SQ_ENC0_WO + l]) + row(base + 3)
        z1 = layernorm(z + a, base + 4, base + 5)
        hid = jnp.maximum(
            mm(z1, w1_ref[FFN_ENC0 + l]) + vf_ref[FFN_ENC0 + l:FFN_ENC0 + l + 1, :],
            0.0)
        ff = mm(hid, w2_ref[FFN_ENC0 + l]) + row(base + 6)
        z = layernorm(z1 + ff, base + 7, base + 8)

    # 8) TransformerDecoderLayer on the last timestep (tgt length == 1)
    base = VD_DEC_BASE
    t = z[W - 1:W, :]                                              # (1, d)
    # length-1 target: softmax over a single key == 1 -> self-attn = out(v_proj)
    sa = mm(mm(t, sq_w_ref[SQ_DEC_SELF_WV]) + row(base + 0),
            sq_w_ref[SQ_DEC_SELF_WO]) + row(base + 1)
    t1 = layernorm(t + sa, base + 2, base + 3)
    cw = qkv_w_ref[QKV_DEC_CROSS]                                  # (d, 3d)
    qd = mm(t1, cw[:, 0:d]) + row(base + 4)
    kv = mm(z, cw[:, d:3 * d])                                     # (W, 2d)
    kd = kv[:, 0:d] + row(base + 5)
    vv = kv[:, d:2 * d] + row(base + 6)
    ca = mm(attend(qd, kd, vv), sq_w_ref[SQ_DEC_CROSS_WO]) + row(base + 7)
    t2 = layernorm(t1 + ca, base + 8, base + 9)
    hid = jnp.maximum(mm(t2, w1_ref[FFN_DEC]) + vf_ref[FFN_DEC:FFN_DEC + 1, :],
                      0.0)
    ff = mm(hid, w2_ref[FFN_DEC]) + row(base + 10)
    out = layernorm(t2 + ff, base + 11, base + 12)                 # (1, d)

    o_ref[0] = out.astype(o_ref.dtype)


# ----------------------------------------------------------------------------
# wrapper: one pallas_call, gridded over batch, weights resident
# ----------------------------------------------------------------------------
def positional_encoding(L, d):
    pos = jnp.arange(L, dtype=jnp.float32)[:, None]
    div = jnp.exp(jnp.arange(0, d, 2, dtype=jnp.float32) * (-math.log(10000.0) / d))
    pe = jnp.zeros((L, d), jnp.float32)
    pe = pe.at[:, 0::2].set(jnp.sin(pos * div))
    pe = pe.at[:, 1::2].set(jnp.cos(pos * div))
    return pe


def st_encoder_forward(x, pp, *, mxu_dtype=jnp.bfloat16):
    """x: (B, W, n_features); pp: packed params. Returns (mu, logvar), each (B, d)."""
    B, W, F_in = x.shape
    d = pp["lin_w"].shape[1]
    ffn = pp["w1"].shape[-1]
    scale = 1.0 / math.sqrt(d)
    pe = positional_encoding(W, d)            # single (W, d) block, not tiled

    weights = (pp["lin_w"], pp["conv_w"], pp["qkv_w"], pp["sq_w"],
               pp["w1"], pp["w2"], pp["vec_d"], pp["vec_ffn"])
    args = (x, pe) + weights

    def resident(a):                          # full-array block, stays in VMEM
        nd = a.ndim
        return pl.BlockSpec(a.shape, lambda b, _nd=nd: (0,) * _nd)

    in_specs = ([pl.BlockSpec((1, W, F_in), lambda b: (b, 0, 0)), resident(pe)]
                + [resident(w) for w in weights])
    out_spec = pl.BlockSpec((1, 1, d), lambda b: (b, 0, 0))
    out_shape = jax.ShapeDtypeStruct((B, 1, d), jnp.float32)

    flops = (2 * B * W * d * (F_in + 13 * d + 4 * ffn)
             + 20 * B * W * W * d + 2 * B * d * (8 * d + 2 * ffn))
    bytes_accessed = sum(int(a.size) * a.dtype.itemsize for a in args) + B * d * 4
    cost = pl.CostEstimate(
        flops=int(flops),
        transcendentals=int(B * (4 * W * W + 2 * W * d + 10 * W)),
        bytes_accessed=int(bytes_accessed))

    out = pl.pallas_call(
        functools.partial(_st_encoder_kernel, d=d, scale=scale,
                          mxu_dtype=mxu_dtype),
        grid=(B,),
        in_specs=in_specs,
        out_specs=out_spec,
        out_shape=out_shape,
        compiler_params=pltpu.CompilerParams(
            dimension_semantics=("parallel",),        # v7x megacore; no-op on v5e/v6e
            vmem_limit_bytes=32 * 1024 * 1024),
        cost_estimate=cost,
    )(*args)

    mu = out[:, 0, :]
    # transformer_decoder1 is called twice with identical inputs (eval mode) ->
    # outputs are identical; compute once and reuse for mu and logvar.
    return mu, mu


# ----------------------------------------------------------------------------
# deterministic synthetic parameters (shapes from __init__) + packing
# ----------------------------------------------------------------------------
def init_params(key, n_features, d_model, ffn=256):
    keys = iter(jax.random.split(key, 64))

    def w(shape):
        return (1.0 / math.sqrt(shape[0])) * jax.random.normal(
            next(keys), shape, jnp.float32)

    def zeros2(n):
        return jnp.zeros((1, n), jnp.float32)

    def ones2(n):
        return jnp.ones((1, n), jnp.float32)

    def attn_p():
        return dict(wq=w((d_model, d_model)), bq=zeros2(d_model),
                    wk=w((d_model, d_model)), bk=zeros2(d_model),
                    wv=w((d_model, d_model)), bv=zeros2(d_model),
                    wo=w((d_model, d_model)), bo=zeros2(d_model))

    def enc_p():
        return dict(attn=attn_p(),
                    ln1_g=ones2(d_model), ln1_b=zeros2(d_model),
                    w1=w((d_model, ffn)), b1=zeros2(ffn),
                    w2=w((ffn, d_model)), b2=zeros2(d_model),
                    ln2_g=ones2(d_model), ln2_b=zeros2(d_model))

    def dec_p():
        # Self-attn q/k weights omitted: with a length-1 target the softmax is
        # identity, so the output depends only on the V / out projections.
        return dict(self_wv=w((d_model, d_model)), self_bv=zeros2(d_model),
                    self_wo=w((d_model, d_model)), self_bo=zeros2(d_model),
                    ln1_g=ones2(d_model), ln1_b=zeros2(d_model),
                    cross_wq=w((d_model, d_model)), cross_bq=zeros2(d_model),
                    cross_wk=w((d_model, d_model)), cross_bk=zeros2(d_model),
                    cross_wv=w((d_model, d_model)), cross_bv=zeros2(d_model),
                    cross_wo=w((d_model, d_model)), cross_bo=zeros2(d_model),
                    ln2_g=ones2(d_model), ln2_b=zeros2(d_model),
                    w1=w((d_model, ffn)), b1=zeros2(ffn),
                    w2=w((ffn, d_model)), b2=zeros2(d_model),
                    ln3_g=ones2(d_model), ln3_b=zeros2(d_model))

    def tcn_p():
        # Conv1d(kernel_size=2) stored as two d x d taps (previous / current).
        return dict(conv1_wp=w((d_model, d_model)), conv1_wc=w((d_model, d_model)),
                    conv1_b=zeros2(d_model),
                    conv2_wp=w((d_model, d_model)), conv2_wc=w((d_model, d_model)),
                    conv2_b=zeros2(d_model),
                    attn_wq=w((d_model, d_model)), attn_bq=zeros2(d_model),
                    attn_wk=w((d_model, d_model)), attn_bk=zeros2(d_model),
                    attn_wv=w((d_model, d_model)), attn_bv=zeros2(d_model))

    return dict(
        linear_w=w((n_features, d_model)), linear_b=zeros2(d_model),
        tcna=tcn_p(),          # tcnb exists in the torch module but is unused
        sgnn=dict(wg=w((d_model, d_model)), bg=zeros2(d_model)),
        enc_layers=[enc_p(), enc_p()],
        dec1=dec_p(),          # decoder2 exists in the torch module but is unused
    )


def pack_params(p):
    """Pack the nested params into 8 packed arrays (few large DMAs per call)."""
    t = p["tcna"]
    dp = p["dec1"]
    enc = p["enc_layers"]

    conv_w = jnp.stack([
        jnp.concatenate([t["conv1_wp"], t["conv1_wc"]], axis=0),   # (2d, d)
        jnp.concatenate([t["conv2_wp"], t["conv2_wc"]], axis=0),
    ])

    def qkv(wq, wk, wv):
        return jnp.concatenate([wq, wk, wv], axis=1)               # (d, 3d)

    qkv_w = jnp.stack([
        qkv(t["attn_wq"], t["attn_wk"], t["attn_wv"]),
        qkv(enc[0]["attn"]["wq"], enc[0]["attn"]["wk"], enc[0]["attn"]["wv"]),
        qkv(enc[1]["attn"]["wq"], enc[1]["attn"]["wk"], enc[1]["attn"]["wv"]),
        qkv(dp["cross_wq"], dp["cross_wk"], dp["cross_wv"]),
    ])

    sq_w = jnp.stack([p["sgnn"]["wg"], enc[0]["attn"]["wo"], enc[1]["attn"]["wo"],
                      dp["self_wv"], dp["self_wo"], dp["cross_wo"]])
    w1 = jnp.stack([enc[0]["w1"], enc[1]["w1"], dp["w1"]])
    w2 = jnp.stack([enc[0]["w2"], enc[1]["w2"], dp["w2"]])

    vd_rows = [p["linear_b"], t["conv1_b"], t["conv2_b"],
               t["attn_bq"], t["attn_bk"], t["attn_bv"], p["sgnn"]["bg"]]
    for lp in enc:
        a = lp["attn"]
        vd_rows += [a["bq"], a["bk"], a["bv"], a["bo"],
                    lp["ln1_g"], lp["ln1_b"], lp["b2"], lp["ln2_g"], lp["ln2_b"]]
    vd_rows += [dp["self_bv"], dp["self_bo"], dp["ln1_g"], dp["ln1_b"],
                dp["cross_bq"], dp["cross_bk"], dp["cross_bv"], dp["cross_bo"],
                dp["ln2_g"], dp["ln2_b"], dp["b2"], dp["ln3_g"], dp["ln3_b"]]
    assert len(vd_rows) == VD_ROWS
    vec_d = jnp.concatenate(vd_rows, axis=0)                       # (38, d)
    vec_ffn = jnp.concatenate([enc[0]["b1"], enc[1]["b1"], dp["b1"]], axis=0)

    return dict(lin_w=p["linear_w"], conv_w=conv_w, qkv_w=qkv_w, sq_w=sq_w,
                w1=w1, w2=w2, vec_d=vec_d, vec_ffn=vec_ffn)


# ----------------------------------------------------------------------------
# pure-JAX reference (same math, nested params) for a wiring/parity check
# ----------------------------------------------------------------------------
def st_encoder_reference(x, p):
    B, W, F_in = x.shape
    d = p["linear_w"].shape[1]
    scale = 1.0 / math.sqrt(d)
    pe = positional_encoding(W, d)
    t = p["tcna"]
    dp = p["dec1"]
    r = jnp.arange(W)
    causal = jnp.where(r[None, :] <= r[:, None], 0.0, NEG_INF)

    def softmax(s):
        e = jnp.exp(s - s.max(-1, keepdims=True))
        return e / e.sum(-1, keepdims=True)

    def ln(h, g, b, eps=1e-5):
        mu = h.mean(-1, keepdims=True)
        var = ((h - mu) ** 2).mean(-1, keepdims=True)
        return (h - mu) / jnp.sqrt(var + eps) * g + b

    def per_batch(xb):
        def shift1(a):
            return jnp.concatenate([jnp.zeros((1, d), a.dtype), a[:-1]], axis=0)

        h = jax.nn.relu(xb @ p["linear_w"] + p["linear_b"])
        c1 = jax.nn.relu(shift1(h) @ t["conv1_wp"] + h @ t["conv1_wc"] + t["conv1_b"])
        c2 = jax.nn.relu(shift1(c1) @ t["conv2_wp"] + c1 @ t["conv2_wc"] + t["conv2_b"])
        o = jax.nn.relu(c2 + h)
        q = o @ t["attn_wq"] + t["attn_bq"]
        k = o @ t["attn_wk"] + t["attn_bk"]
        v = o @ t["attn_wv"] + t["attn_bv"]
        tcn = o + softmax(q @ k.T * scale + causal) @ v
        g = jnp.tanh(tcn) * jax.nn.sigmoid(tcn)
        adj = softmax(g @ g.T * scale)
        sg = jax.nn.relu(adj @ g @ p["sgnn"]["wg"] + p["sgnn"]["bg"])
        z = sg + pe
        for lp in p["enc_layers"]:
            a = lp["attn"]
            q = z @ a["wq"] + a["bq"]
            k = z @ a["wk"] + a["bk"]
            v = z @ a["wv"] + a["bv"]
            att = softmax(q @ k.T * scale) @ v @ a["wo"] + a["bo"]
            z1 = ln(z + att, lp["ln1_g"], lp["ln1_b"])
            ff = jax.nn.relu(z1 @ lp["w1"] + lp["b1"]) @ lp["w2"] + lp["b2"]
            z = ln(z1 + ff, lp["ln2_g"], lp["ln2_b"])
        tg = z[-1:, :]
        sa = (tg @ dp["self_wv"] + dp["self_bv"]) @ dp["self_wo"] + dp["self_bo"]
        t1 = ln(tg + sa, dp["ln1_g"], dp["ln1_b"])
        q = t1 @ dp["cross_wq"] + dp["cross_bq"]
        k = z @ dp["cross_wk"] + dp["cross_bk"]
        v = z @ dp["cross_wv"] + dp["cross_bv"]
        ca = softmax(q @ k.T * scale) @ v @ dp["cross_wo"] + dp["cross_bo"]
        t2 = ln(t1 + ca, dp["ln2_g"], dp["ln2_b"])
        ff = jax.nn.relu(t2 @ dp["w1"] + dp["b1"]) @ dp["w2"] + dp["b2"]
        return ln(t2 + ff, dp["ln3_g"], dp["ln3_b"])[0]

    out = jax.vmap(per_batch)(x)
    return out, out


# ----------------------------------------------------------------------------
if __name__ == "__main__":
    B, W, n_features, d_model = 2, 8, 4, 32
    key = jax.random.PRNGKey(0)
    kx, kp = jax.random.split(key)
    x = jax.random.normal(kx, (B, W, n_features), jnp.float32)
    raw = init_params(kp, n_features, d_model)
    packed = pack_params(raw)

    # exact-parity mode (f32 MXU inputs) vs. pure-JAX reference (wiring check;
    # tolerance is loose to absorb TPU default-matmul-precision differences)
    mu_f32, _ = jax.jit(functools.partial(st_encoder_forward,
                                          mxu_dtype=jnp.float32))(x, packed)
    mu_ref, _ = jax.jit(st_encoder_reference)(x, raw)
    jax.block_until_ready((mu_f32, mu_ref))
    err = float(jnp.max(jnp.abs(mu_f32 - mu_ref)))
    assert err < 5e-2, f"parity check failed: max|diff| = {err}"

    # perf mode (bf16 MXU inputs, f32 accumulation & elementwise) -- default
    mu, logvar = jax.jit(st_encoder_forward)(x, packed)
    jax.block_until_ready((mu, logvar))
    assert mu.shape == (B, d_model) and logvar.shape == (B, d_model)
    assert jnp.all(jnp.isfinite(mu)) and jnp.all(jnp.isfinite(logvar))
    print("KERNEL_OK")
</pallas_src>

<mosaic_0001>
module attributes {stable_mosaic.version = 11 : i64} {
  func.func @_st_encoder_kernel(%arg0: i32, %arg1: memref<1x8x4xf32, #tpu.memory_space<vmem>>, %arg2: memref<8x32xf32, #tpu.memory_space<vmem>>, %arg3: memref<4x32xf32, #tpu.memory_space<vmem>>, %arg4: memref<2x64x32xf32, #tpu.memory_space<vmem>>, %arg5: memref<4x32x96xf32, #tpu.memory_space<vmem>>, %arg6: memref<6x32x32xf32, #tpu.memory_space<vmem>>, %arg7: memref<3x32x256xf32, #tpu.memory_space<vmem>>, %arg8: memref<3x256x32xf32, #tpu.memory_space<vmem>>, %arg9: memref<38x32xf32, #tpu.memory_space<vmem>>, %arg10: memref<3x256xf32, #tpu.memory_space<vmem>>, %arg11: memref<1x1x32xf32, #tpu.memory_space<vmem>>) attributes {dimension_semantics = [#tpu.dimension_semantics<parallel>], iteration_bounds = array<i64: 2>, scalar_prefetch = 0 : i64, scratch_operands = 0 : i64, tpu.core_type = #tpu.core_type<tc>, window_params = [{transform_indices = @transform_0, window_bounds = array<i64: 1, 8, 4>}, {pipeline_mode = #tpu.pipeline_mode<synchronous>, transform_indices = @transform_1, window_bounds = array<i64: 8, 32>}, {pipeline_mode = #tpu.pipeline_mode<synchronous>, transform_indices = @transform_2, window_bounds = array<i64: 4, 32>}, {pipeline_mode = #tpu.pipeline_mode<synchronous>, transform_indices = @transform_3, window_bounds = array<i64: 2, 64, 32>}, {pipeline_mode = #tpu.pipeline_mode<synchronous>, transform_indices = @transform_4, window_bounds = array<i64: 4, 32, 96>}, {pipeline_mode = #tpu.pipeline_mode<synchronous>, transform_indices = @transform_5, window_bounds = array<i64: 6, 32, 32>}, {pipeline_mode = #tpu.pipeline_mode<synchronous>, transform_indices = @transform_6, window_bounds = array<i64: 3, 32, 256>}, {pipeline_mode = #tpu.pipeline_mode<synchronous>, transform_indices = @transform_7, window_bounds = array<i64: 3, 256, 32>}, {pipeline_mode = #tpu.pipeline_mode<synchronous>, transform_indices = @transform_8, window_bounds = array<i64: 38, 32>}, {pipeline_mode = #tpu.pipeline_mode<synchronous>, transform_indices = @transform_9, window_bounds = array<i64: 3, 256>}, {transform_indices = @transform_10, window_bounds = array<i64: 1, 1, 32>}]} {
    %c0 = arith.constant 0 : index
    %c0_0 = arith.constant 0 : index
    %c0_1 = arith.constant 0 : index
    %0 = vector.load %arg1[%c0, %c0_0, %c0_1] : memref<1x8x4xf32, #tpu.memory_space<vmem>>, vector<1x8x4xf32>
    %1 = vector.shape_cast %0 : vector<1x8x4xf32> to vector<8x4xf32>
    %2 = tpu.iota {dimensions = array<i32: 0>} : vector<8x8xi32>
    %3 = tpu.iota {dimensions = array<i32: 1>} : vector<8x8xi32>
    %4 = arith.cmpi sle, %3, %2 : vector<8x8xi32>
    %cst = arith.constant 0.000000e+00 : f32
    %cst_2 = arith.constant -1.000000e+30 : f32
    %5 = vector.broadcast %cst : f32 to vector<8x8xf32>
    %6 = vector.broadcast %cst_2 : f32 to vector<8x8xf32>
    %7 = arith.select %4, %5, %6 : vector<8x8xi1>, vector<8x8xf32>
    %c0_3 = arith.constant 0 : index
    %c0_4 = arith.constant 0 : index
    %8 = vector.load %arg3[%c0_3, %c0_4] : memref<4x32xf32, #tpu.memory_space<vmem>>, vector<4x32xf32>
    %cst_5 = arith.constant dense<0.000000e+00> : vector<8x32xf32>
    %9 = tpu.matmul %1, %8, %cst_5 {dimension_numbers = #tpu.dot_dimension_numbers<[1], [0], [0], [1], [0, 0, 1, 1], [], []>} : vector<8x4xf32>, vector<4x32xf32>, vector<8x32xf32> -> vector<8x32xf32>
    %c0_6 = arith.constant 0 : index
    %c0_7 = arith.constant 0 : index
    %10 = vector.load %arg9[%c0_6, %c0_7] : memref<38x32xf32, #tpu.memory_space<vmem>>, vector<1x32xf32>
    %11 = vector.broadcast %10 : vector<1x32xf32> to vector<8x32xf32>
    %12 = arith.addf %9, %11 : vector<8x32xf32>
    %cst_8 = arith.constant 0.000000e+00 : f32
    %13 = vector.broadcast %cst_8 : f32 to vector<8x32xf32>
    %14 = arith.maximumf %12, %13 : vector<8x32xf32>
    %cst_9 = arith.constant 0.000000e+00 : f32
    %15 = vector.broadcast %cst_9 : f32 to vector<1x32xf32>
    %16 = vector.extract_strided_slice %14 {offsets = [0, 0], sizes = [7, 32], strides = [1, 1]} : vector<8x32xf32> to vector<7x32xf32>
    %17 = tpu.concatenate %15, %16 in 0 : vector<1x32xf32>, vector<7x32xf32> -> vector<8x32xf32>
    %18 = tpu.concatenate %17, %14 in 1 : vector<8x32xf32>, vector<8x32xf32> -> vector<8x64xf32>
    %c0_10 = arith.constant 0 : index
    %c0_11 = arith.constant 0 : index
    %c0_12 = arith.constant 0 : index
    %19 = vector.load %arg4[%c0_10, %c0_11, %c0_12] : memref<2x64x32xf32, #tpu.memory_space<vmem>>, vector<1x64x32xf32>
    %20 = vector.shape_cast %19 : vector<1x64x32xf32> to vector<64x32xf32>
    %cst_13 = arith.constant dense<0.000000e+00> : vector<8x32xf32>
    %21 = tpu.matmul %18, %20, %cst_13 {dimension_numbers = #tpu.dot_dimension_numbers<[1], [0], [0], [1], [0, 0, 1, 1], [], []>} : vector<8x64xf32>, vector<64x32xf32>, vector<8x32xf32> -> vector<8x32xf32>
    %c1 = arith.constant 1 : index
    %c0_14 = arith.constant 0 : index
    %22 = vector.load %arg9[%c1, %c0_14] : memref<38x32xf32, #tpu.memory_space<vmem>>, vector<1x32xf32>
    %23 = vector.broadcast %22 : vector<1x32xf32> to vector<8x32xf32>
    %24 = arith.addf %21, %23 : vector<8x32xf32>
    %cst_15 = arith.constant 0.000000e+00 : f32
    %25 = vector.broadcast %cst_15 : f32 to vector<8x32xf32>
    %26 = arith.maximumf %24, %25 : vector<8x32xf32>
    %cst_16 = arith.constant 0.000000e+00 : f32
    %27 = vector.broadcast %cst_16 : f32 to vector<1x32xf32>
    %28 = vector.extract_strided_slice %26 {offsets = [0, 0], sizes = [7, 32], strides = [1, 1]} : vector<8x32xf32> to vector<7x32xf32>
    %29 = tpu.concatenate %27, %28 in 0 : vector<1x32xf32>, vector<7x32xf32> -> vector<8x32xf32>
    %30 = tpu.concatenate %29, %26 in 1 : vector<8x32xf32>, vector<8x32xf32> -> vector<8x64xf32>
    %c1_17 = arith.constant 1 : index
    %c0_18 = arith.constant 0 : index
    %c0_19 = arith.constant 0 : index
    %31 = vector.load %arg4[%c1_17, %c0_18, %c0_19] : memref<2x64x32xf32, #tpu.memory_space<vmem>>, vector<1x64x32xf32>
    %32 = vector.shape_cast %31 : vector<1x64x32xf32> to vector<64x32xf32>
    %cst_20 = arith.constant dense<0.000000e+00> : vector<8x32xf32>
    %33 = tpu.matmul %30, %32, %cst_20 {dimension_numbers = #tpu.dot_dimension_numbers<[1], [0], [0], [1], [0, 0, 1, 1], [], []>} : vector<8x64xf32>, vector<64x32xf32>, vector<8x32xf32> -> vector<8x32xf32>
    %c2 = arith.constant 2 : index
    %c0_21 = arith.constant 0 : index
    %34 = vector.load %arg9[%c2, %c0_21] : memref<38x32xf32, #tpu.memory_space<vmem>>, vector<1x32xf32>
    %35 = vector.broadcast %34 : vector<1x32xf32> to vector<8x32xf32>
    %36 = arith.addf %33, %35 : vector<8x32xf32>
    %cst_22 = arith.constant 0.000000e+00 : f32
    %37 = vector.broadcast %cst_22 : f32 to vector<8x32xf32>
    %38 = arith.maximumf %36, %37 : vector<8x32xf32>
    %39 = arith.addf %38, %14 : vector<8x32xf32>
    %cst_23 = arith.constant 0.000000e+00 : f32
    %40 = vector.broadcast %cst_23 : f32 to vector<8x32xf32>
    %41 = arith.maximumf %39, %40 : vector<8x32xf32>
    %c0_24 = arith.constant 0 : index
    %c0_25 = arith.constant 0 : index
    %c0_26 = arith.constant 0 : index
    %42 = vector.load %arg5[%c0_24, %c0_25, %c0_26] : memref<4x32x96xf32, #tpu.memory_space<vmem>>, vector<1x32x96xf32>
    %43 = vector.shape_cast %42 : vector<1x32x96xf32> to vector<32x96xf32>
    %cst_27 = arith.constant dense<0.000000e+00> : vector<8x96xf32>
    %44 = tpu.matmul %41, %43, %cst_27 {dimension_numbers = #tpu.dot_dimension_numbers<[1], [0], [0], [1], [0, 0, 1, 1], [], []>} : vector<8x32xf32>, vector<32x96xf32>, vector<8x96xf32> -> vector<8x96xf32>
    %45 = vector.extract_strided_slice %44 {offsets = [0, 0], sizes = [8, 32], strides = [1, 1]} : vector<8x96xf32> to vector<8x32xf32>
    %c3 = arith.constant 3 : index
    %c0_28 = arith.constant 0 : index
    %46 = vector.load %arg9[%c3, %c0_28] : memref<38x32xf32, #tpu.memory_space<vmem>>, vector<1x32xf32>
    %47 = vector.broadcast %46 : vector<1x32xf32> to vector<8x32xf32>
    %48 = arith.addf %45, %47 : vector<8x32xf32>
    %49 = vector.extract_strided_slice %44 {offsets = [0, 32], sizes = [8, 32], strides = [1, 1]} : vector<8x96xf32> to vector<8x32xf32>
    %c4 = arith.constant 4 : index
    %c0_29 = arith.constant 0 : index
    %50 = vector.load %arg9[%c4, %c0_29] : memref<38x32xf32, #tpu.memory_space<vmem>>, vector<1x32xf32>
    %51 = vector.broadcast %50 : vector<1x32xf32> to vector<8x32xf32>
    %52 = arith.addf %49, %51 : vector<8x32xf32>
    %53 = vector.extract_strided_slice %44 {offsets = [0, 64], sizes = [8, 32], strides = [1, 1]} : vector<8x96xf32> to vector<8x32xf32>
    %c5 = arith.constant 5 : index
    %c0_30 = arith.constant 0 : index
    %54 = vector.load %arg9[%c5, %c0_30] : memref<38x32xf32, #tpu.memory_space<vmem>>, vector<1x32xf32>
    %55 = vector.broadcast %54 : vector<1x32xf32> to vector<8x32xf32>
    %56 = arith.addf %53, %55 : vector<8x32xf32>
    %cst_31 = arith.constant dense<0.000000e+00> : vector<8x8xf32>
    %57 = tpu.matmul %48, %52, %cst_31 {dimension_numbers = #tpu.dot_dimension_numbers<[1], [1], [0], [0], [0, 0, 1, 0], [], []>} : vector<8x32xf32>, vector<8x32xf32>, vector<8x8xf32> -> vector<8x8xf32>
    %cst_32 = arith.constant 0.176776692 : f32
    %58 = vector.broadcast %cst_32 : f32 to vector<8x8xf32>
    %59 = arith.mulf %57, %58 : vector<8x8xf32>
    %60 = arith.addf %59, %7 : vector<8x8xf32>
    %cst_33 = arith.constant dense<0xFF800000> : vector<8xf32>
    %61 = vector.multi_reduction <maximumf>, %60, %cst_33 [1] : vector<8x8xf32> to vector<8xf32>
    %62 = vector.shape_cast %61 : vector<8xf32> to vector<8x1xf32>
    %63 = vector.broadcast %62 : vector<8x1xf32> to vector<8x8xf32>
    %64 = arith.subf %60, %63 : vector<8x8xf32>
    %65 = math.exp %64 : vector<8x8xf32>
    %cst_34 = arith.constant dense<0.000000e+00> : vector<8xf32>
    %66 = vector.multi_reduction <add>, %65, %cst_34 [1] : vector<8x8xf32> to vector<8xf32>
    %67 = vector.shape_cast %66 : vector<8xf32> to vector<8x1xf32>
    %68 = vector.broadcast %67 : vector<8x1xf32> to vector<8x8xf32>
    %69 = arith.divf %65, %68 : vector<8x8xf32>
    %cst_35 = arith.constant dense<0.000000e+00> : vector<8x32xf32>
    %70 = tpu.matmul %69, %56, %cst_35 {dimension_numbers = #tpu.dot_dimension_numbers<[1], [0], [0], [1], [0, 0, 1, 1], [], []>} : vector<8x8xf32>, vector<8x32xf32>, vector<8x32xf32> -> vector<8x32xf32>
    %71 = arith.addf %41, %70 : vector<8x32xf32>
    %72 = math.tanh %71 : vector<8x32xf32>
    %73 = arith.negf %71 : vector<8x32xf32>
    %74 = math.exp %73 : vector<8x32xf32>
    %cst_36 = arith.constant 1.000000e+00 : f32
    %75 = vector.broadcast %cst_36 : f32 to vector<8x32xf32>
    %76 = arith.addf %75, %74 : vector<8x32xf32>
    %77 = arith.divf %75, %76 : vector<8x32xf32>
    %78 = arith.mulf %72, %77 : vector<8x32xf32>
    %cst_37 = arith.constant dense<0.000000e+00> : vector<8x8xf32>
    %79 = tpu.matmul %78, %78, %cst_37 {dimension_numbers = #tpu.dot_dimension_numbers<[1], [1], [0], [0], [0, 0, 1, 0], [], []>} : vector<8x32xf32>, vector<8x32xf32>, vector<8x8xf32> -> vector<8x8xf32>
    %cst_38 = arith.constant 0.176776692 : f32
    %80 = vector.broadcast %cst_38 : f32 to vector<8x8xf32>
    %81 = arith.mulf %79, %80 : vector<8x8xf32>
    %cst_39 = arith.constant dense<0xFF800000> : vector<8xf32>
    %82 = vector.multi_reduction <maximumf>, %81, %cst_39 [1] : vector<8x8xf32> to vector<8xf32>
    %83 = vector.shape_cast %82 : vector<8xf32> to vector<8x1xf32>
    %84 = vector.broadcast %83 : vector<8x1xf32> to vector<8x8xf32>
    %85 = arith.subf %81, %84 : vector<8x8xf32>
    %86 = math.exp %85 : vector<8x8xf32>
    %cst_40 = arith.constant dense<0.000000e+00> : vector<8xf32>
    %87 = vector.multi_reduction <add>, %86, %cst_40 [1] : vector<8x8xf32> to vector<8xf32>
    %88 = vector.shape_cast %87 : vector<8xf32> to vector<8x1xf32>
    %89 = vector.broadcast %88 : vector<8x1xf32> to vector<8x8xf32>
    %90 = arith.divf %86, %89 : vector<8x8xf32>
    %cst_41 = arith.constant dense<0.000000e+00> : vector<8x32xf32>
    %91 = tpu.matmul %90, %78, %cst_41 {dimension_numbers = #tpu.dot_dimension_numbers<[1], [0], [0], [1], [0, 0, 1, 1], [], []>} : vector<8x8xf32>, vector<8x32xf32>, vector<8x32xf32> -> vector<8x32xf32>
    %c0_42 = arith.constant 0 : index
    %c0_43 = arith.constant 0 : index
    %c0_44 = arith.constant 0 : index
    %92 = vector.load %arg6[%c0_42, %c0_43, %c0_44] : memref<6x32x32xf32, #tpu.memory_space<vmem>>, vector<1x32x32xf32>
    %93 = vector.shape_cast %92 : vector<1x32x32xf32> to vector<32x32xf32>
    %cst_45 = arith.constant dense<0.000000e+00> : vector<8x32xf32>
    %94 = tpu.matmul %91, %93, %cst_45 {dimension_numbers = #tpu.dot_dimension_numbers<[1], [0], [0], [1], [0, 0, 1, 1], [], []>} : vector<8x32xf32>, vector<32x32xf32>, vector<8x32xf32> -> vector<8x32xf32>
    %c6 = arith.constant 6 : index
    %c0_46 = arith.constant 0 : index
    %95 = vector.load %arg9[%c6, %c0_46] : memref<38x32xf32, #tpu.memory_space<vmem>>, vector<1x32xf32>
    %96 = vector.broadcast %95 : vector<1x32xf32> to vector<8x32xf32>
    %97 = arith.addf %94, %96 : vector<8x32xf32>
    %cst_47 = arith.constant 0.000000e+00 : f32
    %98 = vector.broadcast %cst_47 : f32 to vector<8x32xf32>
    %99 = arith.maximumf %97, %98 : vector<8x32xf32>
    %c0_48 = arith.constant 0 : index
    %c0_49 = arith.constant 0 : index
    %100 = vector.load %arg2[%c0_48, %c0_49] : memref<8x32xf32, #tpu.memory_space<vmem>>, vector<8x32xf32>
    %101 = arith.addf %99, %100 : vector<8x32xf32>
    %c1_50 = arith.constant 1 : index
    %c0_51 = arith.constant 0 : index
    %c0_52 = arith.constant 0 : index
    %102 = vector.load %arg5[%c1_50, %c0_51, %c0_52] : memref<4x32x96xf32, #tpu.memory_space<vmem>>, vector<1x32x96xf32>
    %103 = vector.shape_cast %102 : vector<1x32x96xf32> to vector<32x96xf32>
    %cst_53 = arith.constant dense<0.000000e+00> : vector<8x96xf32>
    %104 = tpu.matmul %101, %103, %cst_53 {dimension_numbers = #tpu.dot_dimension_numbers<[1], [0], [0], [1], [0, 0, 1, 1], [], []>} : vector<8x32xf32>, vector<32x96xf32>, vector<8x96xf32> -> vector<8x96xf32>
    %105 = vector.extract_strided_slice %104 {offsets = [0, 0], sizes = [8, 32], strides = [1, 1]} : vector<8x96xf32> to vector<8x32xf32>
    %c7 = arith.constant 7 : index
    %c0_54 = arith.constant 0 : index
    %106 = vector.load %arg9[%c7, %c0_54] : memref<38x32xf32, #tpu.memory_space<vmem>>, vector<1x32xf32>
    %107 = vector.broadcast %106 : vector<1x32xf32> to vector<8x32xf32>
    %108 = arith.addf %105, %107 : vector<8x32xf32>
    %109 = vector.extract_strided_slice %104 {offsets = [0, 32], sizes = [8, 32], strides = [1, 1]} : vector<8x96xf32> to vector<8x32xf32>
    %c8 = arith.constant 8 : index
    %c0_55 = arith.constant 0 : index
    %110 = vector.load %arg9[%c8, %c0_55] : memref<38x32xf32, #tpu.memory_space<vmem>>, vector<1x32xf32>
    %111 = vector.broadcast %110 : vector<1x32xf32> to vector<8x32xf32>
    %112 = arith.addf %109, %111 : vector<8x32xf32>
    %113 = vector.extract_strided_slice %104 {offsets = [0, 64], sizes = [8, 32], strides = [1, 1]} : vector<8x96xf32> to vector<8x32xf32>
    %c9 = arith.constant 9 : index
    %c0_56 = arith.constant 0 : index
    %114 = vector.load %arg9[%c9, %c0_56] : memref<38x32xf32, #tpu.memory_space<vmem>>, vector<1x32xf32>
    %115 = vector.broadcast %114 : vector<1x32xf32> to vector<8x32xf32>
    %116 = arith.addf %113, %115 : vector<8x32xf32>
    %cst_57 = arith.constant dense<0.000000e+00> : vector<8x8xf32>
    %117 = tpu.matmul %108, %112, %cst_57 {dimension_numbers = #tpu.dot_dimension_numbers<[1], [1], [0], [0], [0, 0, 1, 0], [], []>} : vector<8x32xf32>, vector<8x32xf32>, vector<8x8xf32> -> vector<8x8xf32>
    %cst_58 = arith.constant 0.176776692 : f32
    %118 = vector.broadcast %cst_58 : f32 to vector<8x8xf32>
    %119 = arith.mulf %117, %118 : vector<8x8xf32>
    %cst_59 = arith.constant dense<0xFF800000> : vector<8xf32>
    %120 = vector.multi_reduction <maximumf>, %119, %cst_59 [1] : vector<8x8xf32> to vector<8xf32>
    %121 = vector.shape_cast %120 : vector<8xf32> to vector<8x1xf32>
    %122 = vector.broadcast %121 : vector<8x1xf32> to vector<8x8xf32>
    %123 = arith.subf %119, %122 : vector<8x8xf32>
    %124 = math.exp %123 : vector<8x8xf32>
    %cst_60 = arith.constant dense<0.000000e+00> : vector<8xf32>
    %125 = vector.multi_reduction <add>, %124, %cst_60 [1] : vector<8x8xf32> to vector<8xf32>
    %126 = vector.shape_cast %125 : vector<8xf32> to vector<8x1xf32>
    %127 = vector.broadcast %126 : vector<8x1xf32> to vector<8x8xf32>
    %128 = arith.divf %124, %127 : vector<8x8xf32>
    %cst_61 = arith.constant dense<0.000000e+00> : vector<8x32xf32>
    %129 = tpu.matmul %128, %116, %cst_61 {dimension_numbers = #tpu.dot_dimension_numbers<[1], [0], [0], [1], [0, 0, 1, 1], [], []>} : vector<8x8xf32>, vector<8x32xf32>, vector<8x32xf32> -> vector<8x32xf32>
    %c1_62 = arith.constant 1 : index
    %c0_63 = arith.constant 0 : index
    %c0_64 = arith.constant 0 : index
    %130 = vector.load %arg6[%c1_62, %c0_63, %c0_64] : memref<6x32x32xf32, #tpu.memory_space<vmem>>, vector<1x32x32xf32>
    %131 = vector.shape_cast %130 : vector<1x32x32xf32> to vector<32x32xf32>
    %cst_65 = arith.constant dense<0.000000e+00> : vector<8x32xf32>
    %132 = tpu.matmul %129, %131, %cst_65 {dimension_numbers = #tpu.dot_dimension_numbers<[1], [0], [0], [1], [0, 0, 1, 1], [], []>} : vector<8x32xf32>, vector<32x32xf32>, vector<8x32xf32> -> vector<8x32xf32>
    %c10 = arith.constant 10 : index
    %c0_66 = arith.constant 0 : index
    %133 = vector.load %arg9[%c10, %c0_66] : memref<38x32xf32, #tpu.memory_space<vmem>>, vector<1x32xf32>
    %134 = vector.broadcast %133 : vector<1x32xf32> to vector<8x32xf32>
    %135 = arith.addf %132, %134 : vector<8x32xf32>
    %136 = arith.addf %101, %135 : vector<8x32xf32>
    %cst_67 = arith.constant dense<0.000000e+00> : vector<8xf32>
    %137 = vector.multi_reduction <add>, %136, %cst_67 [1] : vector<8x32xf32> to vector<8xf32>
    %138 = vector.shape_cast %137 : vector<8xf32> to vector<8x1xf32>
    %cst_68 = arith.constant 3.200000e+01 : f32
    %139 = vector.broadcast %cst_68 : f32 to vector<8x1xf32>
    %140 = arith.divf %138, %139 : vector<8x1xf32>
    %141 = vector.broadcast %140 : vector<8x1xf32> to vector<8x32xf32>
    %142 = arith.subf %136, %141 : vector<8x32xf32>
    %143 = vector.broadcast %140 : vector<8x1xf32> to vector<8x32xf32>
    %144 = arith.subf %136, %143 : vector<8x32xf32>
    %145 = arith.mulf %142, %144 : vector<8x32xf32>
    %cst_69 = arith.constant dense<0.000000e+00> : vector<8xf32>
    %146 = vector.multi_reduction <add>, %145, %cst_69 [1] : vector<8x32xf32> to vector<8xf32>
    %147 = vector.shape_cast %146 : vector<8xf32> to vector<8x1xf32>
    %cst_70 = arith.constant 3.200000e+01 : f32
    %148 = vector.broadcast %cst_70 : f32 to vector<8x1xf32>
    %149 = arith.divf %147, %148 : vector<8x1xf32>
    %150 = vector.broadcast %140 : vector<8x1xf32> to vector<8x32xf32>
    %151 = arith.subf %136, %150 : vector<8x32xf32>
    %cst_71 = arith.constant 9.99999974E-6 : f32
    %152 = vector.broadcast %cst_71 : f32 to vector<8x1xf32>
    %153 = arith.addf %149, %152 : vector<8x1xf32>
    %154 = math.rsqrt %153 : vector<8x1xf32>
    %155 = vector.broadcast %154 : vector<8x1xf32> to vector<8x32xf32>
    %156 = arith.mulf %151, %155 : vector<8x32xf32>
    %c11 = arith.constant 11 : index
    %c0_72 = arith.constant 0 : index
    %157 = vector.load %arg9[%c11, %c0_72] : memref<38x32xf32, #tpu.memory_space<vmem>>, vector<1x32xf32>
    %158 = vector.broadcast %157 : vector<1x32xf32> to vector<8x32xf32>
    %159 = arith.mulf %156, %158 : vector<8x32xf32>
    %c12 = arith.constant 12 : index
    %c0_73 = arith.constant 0 : index
    %160 = vector.load %arg9[%c12, %c0_73] : memref<38x32xf32, #tpu.memory_space<vmem>>, vector<1x32xf32>
    %161 = vector.broadcast %160 : vector<1x32xf32> to vector<8x32xf32>
    %162 = arith.addf %159, %161 : vector<8x32xf32>
    %c0_74 = arith.constant 0 : index
    %c0_75 = arith.constant 0 : index
    %c0_76 = arith.constant 0 : index
    %163 = vector.load %arg7[%c0_74, %c0_75, %c0_76] : memref<3x32x256xf32, #tpu.memory_space<vmem>>, vector<1x32x256xf32>
    %164 = vector.shape_cast %163 : vector<1x32x256xf32> to vector<32x256xf32>
    %cst_77 = arith.constant dense<0.000000e+00> : vector<8x256xf32>
    %165 = tpu.matmul %162, %164, %cst_77 {dimension_numbers = #tpu.dot_dimension_numbers<[1], [0], [0], [1], [0, 0, 1, 1], [], []>} : vector<8x32xf32>, vector<32x256xf32>, vector<8x256xf32> -> vector<8x256xf32>
    %c0_78 = arith.constant 0 : index
    %c0_79 = arith.constant 0 : index
    %166 = vector.load %arg10[%c0_78, %c0_79] : memref<3x256xf32, #tpu.memory_space<vmem>>, vector<1x256xf32>
    %167 = vector.broadcast %166 : vector<1x256xf32> to vector<8x256xf32>
    %168 = arith.addf %165, %167 : vector<8x256xf32>
    %cst_80 = arith.constant 0.000000e+00 : f32
    %169 = vector.broadcast %cst_80 : f32 to vector<8x256xf32>
    %170 = arith.maximumf %168, %169 : vector<8x256xf32>
    %c0_81 = arith.constant 0 : index
    %c0_82 = arith.constant 0 : index
    %c0_83 = arith.constant 0 : index
    %171 = vector.load %arg8[%c0_81, %c0_82, %c0_83] : memref<3x256x32xf32, #tpu.memory_space<vmem>>, vector<1x256x32xf32>
    %172 = vector.shape_cast %171 : vector<1x256x32xf32> to vector<256x32xf32>
    %cst_84 = arith.constant dense<0.000000e+00> : vector<8x32xf32>
    %173 = tpu.matmul %170, %172, %cst_84 {dimension_numbers = #tpu.dot_dimension_numbers<[1], [0], [0], [1], [0, 0, 1, 1], [], []>} : vector<8x256xf32>, vector<256x32xf32>, vector<8x32xf32> -> vector<8x32xf32>
    %c13 = arith.constant 13 : index
    %c0_85 = arith.constant 0 : index
    %174 = vector.load %arg9[%c13, %c0_85] : memref<38x32xf32, #tpu.memory_space<vmem>>, vector<1x32xf32>
    %175 = vector.broadcast %174 : vector<1x32xf32> to vector<8x32xf32>
    %176 = arith.addf %173, %175 : vector<8x32xf32>
    %177 = arith.addf %162, %176 : vector<8x32xf32>
    %cst_86 = arith.constant dense<0.000000e+00> : vector<8xf32>
    %178 = vector.multi_reduction <add>, %177, %cst_86 [1] : vector<8x32xf32> to vector<8xf32>
    %179 = vector.shape_cast %178 : vector<8xf32> to vector<8x1xf32>
    %cst_87 = arith.constant 3.200000e+01 : f32
    %180 = vector.broadcast %cst_87 : f32 to vector<8x1xf32>
    %181 = arith.divf %179, %180 : vector<8x1xf32>
    %182 = vector.broadcast %181 : vector<8x1xf32> to vector<8x32xf32>
    %183 = arith.subf %177, %182 : vector<8x32xf32>
    %184 = vector.broadcast %181 : vector<8x1xf32> to vector<8x32xf32>
    %185 = arith.subf %177, %184 : vector<8x32xf32>
    %186 = arith.mulf %183, %185 : vector<8x32xf32>
    %cst_88 = arith.constant dense<0.000000e+00> : vector<8xf32>
    %187 = vector.multi_reduction <add>, %186, %cst_88 [1] : vector<8x32xf32> to vector<8xf32>
    %188 = vector.shape_cast %187 : vector<8xf32> to vector<8x1xf32>
    %cst_89 = arith.constant 3.200000e+01 : f32
    %189 = vector.broadcast %cst_89 : f32 to vector<8x1xf32>
    %190 = arith.divf %188, %189 : vector<8x1xf32>
    %191 = vector.broadcast %181 : vector<8x1xf32> to vector<8x32xf32>
    %192 = arith.subf %177, %191 : vector<8x32xf32>
    %cst_90 = arith.constant 9.99999974E-6 : f32
    %193 = vector.broadcast %cst_90 : f32 to vector<8x1xf32>
    %194 = arith.addf %190, %193 : vector<8x1xf32>
    %195 = math.rsqrt %194 : vector<8x1xf32>
    %196 = vector.broadcast %195 : vector<8x1xf32> to vector<8x32xf32>
    %197 = arith.mulf %192, %196 : vector<8x32xf32>
    %c14 = arith.constant 14 : index
    %c0_91 = arith.constant 0 : index
    %198 = vector.load %arg9[%c14, %c0_91] : memref<38x32xf32, #tpu.memory_space<vmem>>, vector<1x32xf32>
    %199 = vector.broadcast %198 : vector<1x32xf32> to vector<8x32xf32>
    %200 = arith.mulf %197, %199 : vector<8x32xf32>
    %c15 = arith.constant 15 : index
    %c0_92 = arith.constant 0 : index
    %201 = vector.load %arg9[%c15, %c0_92] : memref<38x32xf32, #tpu.memory_space<vmem>>, vector<1x32xf32>
    %202 = vector.broadcast %201 : vector<1x32xf32> to vector<8x32xf32>
    %203 = arith.addf %200, %202 : vector<8x32xf32>
    %c2_93 = arith.constant 2 : index
    %c0_94 = arith.constant 0 : index
    %c0_95 = arith.constant 0 : index
    %204 = vector.load %arg5[%c2_93, %c0_94, %c0_95] : memref<4x32x96xf32, #tpu.memory_space<vmem>>, vector<1x32x96xf32>
    %205 = vector.shape_cast %204 : vector<1x32x96xf32> to vector<32x96xf32>
    %cst_96 = arith.constant dense<0.000000e+00> : vector<8x96xf32>
    %206 = tpu.matmul %203, %205, %cst_96 {dimension_numbers = #tpu.dot_dimension_numbers<[1], [0], [0], [1], [0, 0, 1, 1], [], []>} : vector<8x32xf32>, vector<32x96xf32>, vector<8x96xf32> -> vector<8x96xf32>
    %207 = vector.extract_strided_slice %206 {offsets = [0, 0], sizes = [8, 32], strides = [1, 1]} : vector<8x96xf32> to vector<8x32xf32>
    %c16 = arith.constant 16 : index
    %c0_97 = arith.constant 0 : index
    %208 = vector.load %arg9[%c16, %c0_97] : memref<38x32xf32, #tpu.memory_space<vmem>>, vector<1x32xf32>
    %209 = vector.broadcast %208 : vector<1x32xf32> to vector<8x32xf32>
    %210 = arith.addf %207, %209 : vector<8x32xf32>
    %211 = vector.extract_strided_slice %206 {offsets = [0, 32], sizes = [8, 32], strides = [1, 1]} : vector<8x96xf32> to vector<8x32xf32>
    %c17 = arith.constant 17 : index
    %c0_98 = arith.constant 0 : index
    %212 = vector.load %arg9[%c17, %c0_98] : memref<38x32xf32, #tpu.memory_space<vmem>>, vector<1x32xf32>
    %213 = vector.broadcast %212 : vector<1x32xf32> to vector<8x32xf32>
    %214 = arith.addf %211, %213 : vector<8x32xf32>
    %215 = vector.extract_strided_slice %206 {offsets = [0, 64], sizes = [8, 32], strides = [1, 1]} : vector<8x96xf32> to vector<8x32xf32>
    %c18 = arith.constant 18 : index
    %c0_99 = arith.constant 0 : index
    %216 = vector.load %arg9[%c18, %c0_99] : memref<38x32xf32, #tpu.memory_space<vmem>>, vector<1x32xf32>
    %217 = vector.broadcast %216 : vector<1x32xf32> to vector<8x32xf32>
    %218 = arith.addf %215, %217 : vector<8x32xf32>
    %cst_100 = arith.constant dense<0.000000e+00> : vector<8x8xf32>
    %219 = tpu.matmul %210, %214, %cst_100 {dimension_numbers = #tpu.dot_dimension_numbers<[1], [1], [0], [0], [0, 0, 1, 0], [], []>} : vector<8x32xf32>, vector<8x32xf32>, vector<8x8xf32> -> vector<8x8xf32>
    %cst_101 = arith.constant 0.176776692 : f32
    %220 = vector.broadcast %cst_101 : f32 to vector<8x8xf32>
    %221 = arith.mulf %219, %220 : vector<8x8xf32>
    %cst_102 = arith.constant dense<0xFF800000> : vector<8xf32>
    %222 = vector.multi_reduction <maximumf>, %221, %cst_102 [1] : vector<8x8xf32> to vector<8xf32>
    %223 = vector.shape_cast %222 : vector<8xf32> to vector<8x1xf32>
    %224 = vector.broadcast %223 : vector<8x1xf32> to vector<8x8xf32>
    %225 = arith.subf %221, %224 : vector<8x8xf32>
    %226 = math.exp %225 : vector<8x8xf32>
    %cst_103 = arith.constant dense<0.000000e+00> : vector<8xf32>
    %227 = vector.multi_reduction <add>, %226, %cst_103 [1] : vector<8x8xf32> to vector<8xf32>
    %228 = vector.shape_cast %227 : vector<8xf32> to vector<8x1xf32>
    %229 = vector.broadcast %228 : vector<8x1xf32> to vector<8x8xf32>
    %230 = arith.divf %226, %229 : vector<8x8xf32>
    %cst_104 = arith.constant dense<0.000000e+00> : vector<8x32xf32>
    %231 = tpu.matmul %230, %218, %cst_104 {dimension_numbers = #tpu.dot_dimension_numbers<[1], [0], [0], [1], [0, 0, 1, 1], [], []>} : vector<8x8xf32>, vector<8x32xf32>, vector<8x32xf32> -> vector<8x32xf32>
    %c2_105 = arith.constant 2 : index
    %c0_106 = arith.constant 0 : index
    %c0_107 = arith.constant 0 : index
    %232 = vector.load %arg6[%c2_105, %c0_106, %c0_107] : memref<6x32x32xf32, #tpu.memory_space<vmem>>, vector<1x32x32xf32>
    %233 = vector.shape_cast %232 : vector<1x32x32xf32> to vector<32x32xf32>
    %cst_108 = arith.constant dense<0.000000e+00> : vector<8x32xf32>
    %234 = tpu.matmul %231, %233, %cst_108 {dimension_numbers = #tpu.dot_dimension_numbers<[1], [0], [0], [1], [0, 0, 1, 1], [], []>} : vector<8x32xf32>, vector<32x32xf32>, vector<8x32xf32> -> vector<8x32xf32>
    %c19 = arith.constant 19 : index
    %c0_109 = arith.constant 0 : index
    %235 = vector.load %arg9[%c19, %c0_109] : memref<38x32xf32, #tpu.memory_space<vmem>>, vector<1x32xf32>
    %236 = vector.broadcast %235 : vector<1x32xf32> to vector<8x32xf32>
    %237 = arith.addf %234, %236 : vector<8x32xf32>
    %238 = arith.addf %203, %237 : vector<8x32xf32>
    %cst_110 = arith.constant dense<0.000000e+00> : vector<8xf32>
    %239 = vector.multi_reduction <add>, %238, %cst_110 [1] : vector<8x32xf32> to vector<8xf32>
    %240 = vector.shape_cast %239 : vector<8xf32> to vector<8x1xf32>
    %cst_111 = arith.constant 3.200000e+01 : f32
    %241 = vector.broadcast %cst_111 : f32 to vector<8x1xf32>
    %242 = arith.divf %240, %241 : vector<8x1xf32>
    %243 = vector.broadcast %242 : vector<8x1xf32> to vector<8x32xf32>
    %244 = arith.subf %238, %243 : vector<8x32xf32>
    %245 = vector.broadcast %242 : vector<8x1xf32> to vector<8x32xf32>
    %246 = arith.subf %238, %245 : vector<8x32xf32>
    %247 = arith.mulf %244, %246 : vector<8x32xf32>
    %cst_112 = arith.constant dense<0.000000e+00> : vector<8xf32>
    %248 = vector.multi_reduction <add>, %247, %cst_112 [1] : vector<8x32xf32> to vector<8xf32>
    %249 = vector.shape_cast %248 : vector<8xf32> to vector<8x1xf32>
    %cst_113 = arith.constant 3.200000e+01 : f32
    %250 = vector.broadcast %cst_113 : f32 to vector<8x1xf32>
    %251 = arith.divf %249, %250 : vector<8x1xf32>
    %252 = vector.broadcast %242 : vector<8x1xf32> to vector<8x32xf32>
    %253 = arith.subf %238, %252 : vector<8x32xf32>
    %cst_114 = arith.constant 9.99999974E-6 : f32
    %254 = vector.broadcast %cst_114 : f32 to vector<8x1xf32>
    %255 = arith.addf %251, %254 : vector<8x1xf32>
    %256 = math.rsqrt %255 : vector<8x1xf32>
    %257 = vector.broadcast %256 : vector<8x1xf32> to vector<8x32xf32>
    %258 = arith.mulf %253, %257 : vector<8x32xf32>
    %c20 = arith.constant 20 : index
    %c0_115 = arith.constant 0 : index
    %259 = vector.load %arg9[%c20, %c0_115] : memref<38x32xf32, #tpu.memory_space<vmem>>, vector<1x32xf32>
    %260 = vector.broadcast %259 : vector<1x32xf32> to vector<8x32xf32>
    %261 = arith.mulf %258, %260 : vector<8x32xf32>
    %c21 = arith.constant 21 : index
    %c0_116 = arith.constant 0 : index
    %262 = vector.load %arg9[%c21, %c0_116] : memref<38x32xf32, #tpu.memory_space<vmem>>, vector<1x32xf32>
    %263 = vector.broadcast %262 : vector<1x32xf32> to vector<8x32xf32>
    %264 = arith.addf %261, %263 : vector<8x32xf32>
    %c1_117 = arith.constant 1 : index
    %c0_118 = arith.constant 0 : index
    %c0_119 = arith.constant 0 : index
    %265 = vector.load %arg7[%c1_117, %c0_118, %c0_119] : memref<3x32x256xf32, #tpu.memory_space<vmem>>, vector<1x32x256xf32>
    %266 = vector.shape_cast %265 : vector<1x32x256xf32> to vector<32x256xf32>
    %cst_120 = arith.constant dense<0.000000e+00> : vector<8x256xf32>
    %267 = tpu.matmul %264, %266, %cst_120 {dimension_numbers = #tpu.dot_dimension_numbers<[1], [0], [0], [1], [0, 0, 1, 1], [], []>} : vector<8x32xf32>, vector<32x256xf32>, vector<8x256xf32> -> vector<8x256xf32>
    %c1_121 = arith.constant 1 : index
    %c0_122 = arith.constant 0 : index
    %268 = vector.load %arg10[%c1_121, %c0_122] : memref<3x256xf32, #tpu.memory_space<vmem>>, vector<1x256xf32>
    %269 = vector.broadcast %268 : vector<1x256xf32> to vector<8x256xf32>
    %270 = arith.addf %267, %269 : vector<8x256xf32>
    %cst_123 = arith.constant 0.000000e+00 : f32
    %271 = vector.broadcast %cst_123 : f32 to vector<8x256xf32>
    %272 = arith.maximumf %270, %271 : vector<8x256xf32>
    %c1_124 = arith.constant 1 : index
    %c0_125 = arith.constant 0 : index
    %c0_126 = arith.constant 0 : index
    %273 = vector.load %arg8[%c1_124, %c0_125, %c0_126] : memref<3x256x32xf32, #tpu.memory_space<vmem>>, vector<1x256x32xf32>
    %274 = vector.shape_cast %273 : vector<1x256x32xf32> to vector<256x32xf32>
    %cst_127 = arith.constant dense<0.000000e+00> : vector<8x32xf32>
    %275 = tpu.matmul %272, %274, %cst_127 {dimension_numbers = #tpu.dot_dimension_numbers<[1], [0], [0], [1], [0, 0, 1, 1], [], []>} : vector<8x256xf32>, vector<256x32xf32>, vector<8x32xf32> -> vector<8x32xf32>
    %c22 = arith.constant 22 : index
    %c0_128 = arith.constant 0 : index
    %276 = vector.load %arg9[%c22, %c0_128] : memref<38x32xf32, #tpu.memory_space<vmem>>, vector<1x32xf32>
    %277 = vector.broadcast %276 : vector<1x32xf32> to vector<8x32xf32>
    %278 = arith.addf %275, %277 : vector<8x32xf32>
    %279 = arith.addf %264, %278 : vector<8x32xf32>
    %cst_129 = arith.constant dense<0.000000e+00> : vector<8xf32>
    %280 = vector.multi_reduction <add>, %279, %cst_129 [1] : vector<8x32xf32> to vector<8xf32>
    %281 = vector.shape_cast %280 : vector<8xf32> to vector<8x1xf32>
    %cst_130 = arith.constant 3.200000e+01 : f32
    %282 = vector.broadcast %cst_130 : f32 to vector<8x1xf32>
    %283 = arith.divf %281, %282 : vector<8x1xf32>
    %284 = vector.broadcast %283 : vector<8x1xf32> to vector<8x32xf32>
    %285 = arith.subf %279, %284 : vector<8x32xf32>
    %286 = vector.broadcast %283 : vector<8x1xf32> to vector<8x32xf32>
    %287 = arith.subf %279, %286 : vector<8x32xf32>
    %288 = arith.mulf %285, %287 : vector<8x32xf32>
    %cst_131 = arith.constant dense<0.000000e+00> : vector<8xf32>
    %289 = vector.multi_reduction <add>, %288, %cst_131 [1] : vector<8x32xf32> to vector<8xf32>
    %290 = vector.shape_cast %289 : vector<8xf32> to vector<8x1xf32>
    %cst_132 = arith.constant 3.200000e+01 : f32
    %291 = vector.broadcast %cst_132 : f32 to vector<8x1xf32>
    %292 = arith.divf %290, %291 : vector<8x1xf32>
    %293 = vector.broadcast %283 : vector<8x1xf32> to vector<8x32xf32>
    %294 = arith.subf %279, %293 : vector<8x32xf32>
    %cst_133 = arith.constant 9.99999974E-6 : f32
    %295 = vector.broadcast %cst_133 : f32 to vector<8x1xf32>
    %296 = arith.addf %292, %295 : vector<8x1xf32>
    %297 = math.rsqrt %296 : vector<8x1xf32>
    %298 = vector.broadcast %297 : vector<8x1xf32> to vector<8x32xf32>
    %299 = arith.mulf %294, %298 : vector<8x32xf32>
    %c23 = arith.constant 23 : index
    %c0_134 = arith.constant 0 : index
    %300 = vector.load %arg9[%c23, %c0_134] : memref<38x32xf32, #tpu.memory_space<vmem>>, vector<1x32xf32>
    %301 = vector.broadcast %300 : vector<1x32xf32> to vector<8x32xf32>
    %302 = arith.mulf %299, %301 : vector<8x32xf32>
    %c24 = arith.constant 24 : index
    %c0_135 = arith.constant 0 : index
    %303 = vector.load %arg9[%c24, %c0_135] : memref<38x32xf32, #tpu.memory_space<vmem>>, vector<1x32xf32>
    %304 = vector.broadcast %303 : vector<1x32xf32> to vector<8x32xf32>
    %305 = arith.addf %302, %304 : vector<8x32xf32>
    %306 = vector.extract_strided_slice %305 {offsets = [7, 0], sizes = [1, 32], strides = [1, 1]} : vector<8x32xf32> to vector<1x32xf32>
    %c3_136 = arith.constant 3 : index
    %c0_137 = arith.constant 0 : index
    %c0_138 = arith.constant 0 : index
    %307 = vector.load %arg6[%c3_136, %c0_137, %c0_138] : memref<6x32x32xf32, #tpu.memory_space<vmem>>, vector<1x32x32xf32>
    %308 = vector.shape_cast %307 : vector<1x32x32xf32> to vector<32x32xf32>
    %cst_139 = arith.constant dense<0.000000e+00> : vector<1x32xf32>
    %309 = tpu.matmul %306, %308, %cst_139 {dimension_numbers = #tpu.dot_dimension_numbers<[1], [0], [0], [1], [0, 0, 1, 1], [], []>} : vector<1x32xf32>, vector<32x32xf32>, vector<1x32xf32> -> vector<1x32xf32>
    %c25 = arith.constant 25 : index
    %c0_140 = arith.constant 0 : index
    %310 = vector.load %arg9[%c25, %c0_140] : memref<38x32xf32, #tpu.memory_space<vmem>>, vector<1x32xf32>
    %311 = arith.addf %309, %310 : vector<1x32xf32>
    %c4_141 = arith.constant 4 : index
    %c0_142 = arith.constant 0 : index
    %c0_143 = arith.constant 0 : index
    %312 = vector.load %arg6[%c4_141, %c0_142, %c0_143] : memref<6x32x32xf32, #tpu.memory_space<vmem>>, vector<1x32x32xf32>
    %313 = vector.shape_cast %312 : vector<1x32x32xf32> to vector<32x32xf32>
    %cst_144 = arith.constant dense<0.000000e+00> : vector<1x32xf32>
    %314 = tpu.matmul %311, %313, %cst_144 {dimension_numbers = #tpu.dot_dimension_numbers<[1], [0], [0], [1], [0, 0, 1, 1], [], []>} : vector<1x32xf32>, vector<32x32xf32>, vector<1x32xf32> -> vector<1x32xf32>
    %c26 = arith.constant 26 : index
    %c0_145 = arith.constant 0 : index
    %315 = vector.load %arg9[%c26, %c0_145] : memref<38x32xf32, #tpu.memory_space<vmem>>, vector<1x32xf32>
    %316 = arith.addf %314, %315 : vector<1x32xf32>
    %317 = arith.addf %306, %316 : vector<1x32xf32>
    %cst_146 = arith.constant dense<0.000000e+00> : vector<1xf32>
    %318 = vector.multi_reduction <add>, %317, %cst_146 [1] : vector<1x32xf32> to vector<1xf32>
    %319 = vector.shape_cast %318 : vector<1xf32> to vector<1x1xf32>
    %cst_147 = arith.constant 3.200000e+01 : f32
    %320 = vector.broadcast %cst_147 : f32 to vector<1x1xf32>
    %321 = arith.divf %319, %320 : vector<1x1xf32>
    %322 = vector.broadcast %321 : vector<1x1xf32> to vector<1x32xf32>
    %323 = arith.subf %317, %322 : vector<1x32xf32>
    %324 = vector.broadcast %321 : vector<1x1xf32> to vector<1x32xf32>
    %325 = arith.subf %317, %324 : vector<1x32xf32>
    %326 = arith.mulf %323, %325 : vector<1x32xf32>
    %cst_148 = arith.constant dense<0.000000e+00> : vector<1xf32>
    %327 = vector.multi_reduction <add>, %326, %cst_148 [1] : vector<1x32xf32> to vector<1xf32>
    %328 = vector.shape_cast %327 : vector<1xf32> to vector<1x1xf32>
    %cst_149 = arith.constant 3.200000e+01 : f32
    %329 = vector.broadcast %cst_149 : f32 to vector<1x1xf32>
    %330 = arith.divf %328, %329 : vector<1x1xf32>
    %331 = vector.broadcast %321 : vector<1x1xf32> to vector<1x32xf32>
    %332 = arith.subf %317, %331 : vector<1x32xf32>
    %cst_150 = arith.constant 9.99999974E-6 : f32
    %333 = vector.broadcast %cst_150 : f32 to vector<1x1xf32>
    %334 = arith.addf %330, %333 : vector<1x1xf32>
    %335 = math.rsqrt %334 : vector<1x1xf32>
    %336 = vector.broadcast %335 : vector<1x1xf32> to vector<1x32xf32>
    %337 = arith.mulf %332, %336 : vector<1x32xf32>
    %c27 = arith.constant 27 : index
    %c0_151 = arith.constant 0 : index
    %338 = vector.load %arg9[%c27, %c0_151] : memref<38x32xf32, #tpu.memory_space<vmem>>, vector<1x32xf32>
    %339 = arith.mulf %337, %338 : vector<1x32xf32>
    %c28 = arith.constant 28 : index
    %c0_152 = arith.constant 0 : index
    %340 = vector.load %arg9[%c28, %c0_152] : memref<38x32xf32, #tpu.memory_space<vmem>>, vector<1x32xf32>
    %341 = arith.addf %339, %340 : vector<1x32xf32>
    %c3_153 = arith.constant 3 : index
    %c0_154 = arith.constant 0 : index
    %c0_155 = arith.constant 0 : index
    %342 = vector.load %arg5[%c3_153, %c0_154, %c0_155] : memref<4x32x96xf32, #tpu.memory_space<vmem>>, vector<1x32x96xf32>
    %343 = vector.shape_cast %342 : vector<1x32x96xf32> to vector<32x96xf32>
    %344 = vector.extract_strided_slice %343 {offsets = [0, 0], sizes = [32, 32], strides = [1, 1]} : vector<32x96xf32> to vector<32x32xf32>
    %cst_156 = arith.constant dense<0.000000e+00> : vector<1x32xf32>
    %345 = tpu.matmul %341, %344, %cst_156 {dimension_numbers = #tpu.dot_dimension_numbers<[1], [0], [0], [1], [0, 0, 1, 1], [], []>} : vector<1x32xf32>, vector<32x32xf32>, vector<1x32xf32> -> vector<1x32xf32>
    %c29 = arith.constant 29 : index
    %c0_157 = arith.constant 0 : index
    %346 = vector.load %arg9[%c29, %c0_157] : memref<38x32xf32, #tpu.memory_space<vmem>>, vector<1x32xf32>
    %347 = arith.addf %345, %346 : vector<1x32xf32>
    %348 = vector.extract_strided_slice %343 {offsets = [0, 32], sizes = [32, 64], strides = [1, 1]} : vector<32x96xf32> to vector<32x64xf32>
    %cst_158 = arith.constant dense<0.000000e+00> : vector<8x64xf32>
    %349 = tpu.matmul %305, %348, %cst_158 {dimension_numbers = #tpu.dot_dimension_numbers<[1], [0], [0], [1], [0, 0, 1, 1], [], []>} : vector<8x32xf32>, vector<32x64xf32>, vector<8x64xf32> -> vector<8x64xf32>
    %350 = vector.extract_strided_slice %349 {offsets = [0, 0], sizes = [8, 32], strides = [1, 1]} : vector<8x64xf32> to vector<8x32xf32>
    %c30 = arith.constant 30 : index
    %c0_159 = arith.constant 0 : index
    %351 = vector.load %arg9[%c30, %c0_159] : memref<38x32xf32, #tpu.memory_space<vmem>>, vector<1x32xf32>
    %352 = vector.broadcast %351 : vector<1x32xf32> to vector<8x32xf32>
    %353 = arith.addf %350, %352 : vector<8x32xf32>
    %354 = vector.extract_strided_slice %349 {offsets = [0, 32], sizes = [8, 32], strides = [1, 1]} : vector<8x64xf32> to vector<8x32xf32>
    %c31 = arith.constant 31 : index
    %c0_160 = arith.constant 0 : index
    %355 = vector.load %arg9[%c31, %c0_160] : memref<38x32xf32, #tpu.memory_space<vmem>>, vector<1x32xf32>
    %356 = vector.broadcast %355 : vector<1x32xf32> to vector<8x32xf32>
    %357 = arith.addf %354, %356 : vector<8x32xf32>
    %cst_161 = arith.constant dense<0.000000e+00> : vector<1x8xf32>
    %358 = tpu.matmul %347, %353, %cst_161 {dimension_numbers = #tpu.dot_dimension_numbers<[1], [1], [0], [0], [0, 0, 1, 0], [], []>} : vector<1x32xf32>, vector<8x32xf32>, vector<1x8xf32> -> vector<1x8xf32>
    %cst_162 = arith.constant 0.176776692 : f32
    %359 = vector.broadcast %cst_162 : f32 to vector<1x8xf32>
    %360 = arith.mulf %358, %359 : vector<1x8xf32>
    %cst_163 = arith.constant dense<0xFF800000> : vector<1xf32>
    %361 = vector.multi_reduction <maximumf>, %360, %cst_163 [1] : vector<1x8xf32> to vector<1xf32>
    %362 = vector.shape_cast %361 : vector<1xf32> to vector<1x1xf32>
    %363 = vector.broadcast %362 : vector<1x1xf32> to vector<1x8xf32>
    %364 = arith.subf %360, %363 : vector<1x8xf32>
    %365 = math.exp %364 : vector<1x8xf32>
    %cst_164 = arith.constant dense<0.000000e+00> : vector<1xf32>
    %366 = vector.multi_reduction <add>, %365, %cst_164 [1] : vector<1x8xf32> to vector<1xf32>
    %367 = vector.shape_cast %366 : vector<1xf32> to vector<1x1xf32>
    %368 = vector.broadcast %367 : vector<1x1xf32> to vector<1x8xf32>
    %369 = arith.divf %365, %368 : vector<1x8xf32>
    %cst_165 = arith.constant dense<0.000000e+00> : vector<1x32xf32>
    %370 = tpu.matmul %369, %357, %cst_165 {dimension_numbers = #tpu.dot_dimension_numbers<[1], [0], [0], [1], [0, 0, 1, 1], [], []>} : vector<1x8xf32>, vector<8x32xf32>, vector<1x32xf32> -> vector<1x32xf32>
    %c5_166 = arith.constant 5 : index
    %c0_167 = arith.constant 0 : index
    %c0_168 = arith.constant 0 : index
    %371 = vector.load %arg6[%c5_166, %c0_167, %c0_168] : memref<6x32x32xf32, #tpu.memory_space<vmem>>, vector<1x32x32xf32>
    %372 = vector.shape_cast %371 : vector<1x32x32xf32> to vector<32x32xf32>
    %cst_169 = arith.constant dense<0.000000e+00> : vector<1x32xf32>
    %373 = tpu.matmul %370, %372, %cst_169 {dimension_numbers = #tpu.dot_dimension_numbers<[1], [0], [0], [1], [0, 0, 1, 1], [], []>} : vector<1x32xf32>, vector<32x32xf32>, vector<1x32xf32> -> vector<1x32xf32>
    %c32 = arith.constant 32 : index
    %c0_170 = arith.constant 0 : index
    %374 = vector.load %arg9[%c32, %c0_170] : memref<38x32xf32, #tpu.memory_space<vmem>>, vector<1x32xf32>
    %375 = arith.addf %373, %374 : vector<1x32xf32>
    %376 = arith.addf %341, %375 : vector<1x32xf32>
    %cst_171 = arith.constant dense<0.000000e+00> : vector<1xf32>
    %377 = vector.multi_reduction <add>, %376, %cst_171 [1] : vector<1x32xf32> to vector<1xf32>
    %378 = vector.shape_cast %377 : vector<1xf32> to vector<1x1xf32>
    %cst_172 = arith.constant 3.200000e+01 : f32
    %379 = vector.broadcast %cst_172 : f32 to vector<1x1xf32>
    %380 = arith.divf %378, %379 : vector<1x1xf32>
    %381 = vector.broadcast %380 : vector<1x1xf32> to vector<1x32xf32>
    %382 = arith.subf %376, %381 : vector<1x32xf32>
    %383 = vector.broadcast %380 : vector<1x1xf32> to vector<1x32xf32>
    %384 = arith.subf %376, %383 : vector<1x32xf32>
    %385 = arith.mulf %382, %384 : vector<1x32xf32>
    %cst_173 = arith.constant dense<0.000000e+00> : vector<1xf32>
    %386 = vector.multi_reduction <add>, %385, %cst_173 [1] : vector<1x32xf32> to vector<1xf32>
    %387 = vector.shape_cast %386 : vector<1xf32> to vector<1x1xf32>
    %cst_174 = arith.constant 3.200000e+01 : f32
    %388 = vector.broadcast %cst_174 : f32 to vector<1x1xf32>
    %389 = arith.divf %387, %388 : vector<1x1xf32>
    %390 = vector.broadcast %380 : vector<1x1xf32> to vector<1x32xf32>
    %391 = arith.subf %376, %390 : vector<1x32xf32>
    %cst_175 = arith.constant 9.99999974E-6 : f32
    %392 = vector.broadcast %cst_175 : f32 to vector<1x1xf32>
    %393 = arith.addf %389, %392 : vector<1x1xf32>
    %394 = math.rsqrt %393 : vector<1x1xf32>
    %395 = vector.broadcast %394 : vector<1x1xf32> to vector<1x32xf32>
    %396 = arith.mulf %391, %395 : vector<1x32xf32>
    %c33 = arith.constant 33 : index
    %c0_176 = arith.constant 0 : index
    %397 = vector.load %arg9[%c33, %c0_176] : memref<38x32xf32, #tpu.memory_space<vmem>>, vector<1x32xf32>
    %398 = arith.mulf %396, %397 : vector<1x32xf32>
    %c34 = arith.constant 34 : index
    %c0_177 = arith.constant 0 : index
    %399 = vector.load %arg9[%c34, %c0_177] : memref<38x32xf32, #tpu.memory_space<vmem>>, vector<1x32xf32>
    %400 = arith.addf %398, %399 : vector<1x32xf32>
    %c2_178 = arith.constant 2 : index
    %c0_179 = arith.constant 0 : index
    %c0_180 = arith.constant 0 : index
    %401 = vector.load %arg7[%c2_178, %c0_179, %c0_180] : memref<3x32x256xf32, #tpu.memory_space<vmem>>, vector<1x32x256xf32>
    %402 = vector.shape_cast %401 : vector<1x32x256xf32> to vector<32x256xf32>
    %cst_181 = arith.constant dense<0.000000e+00> : vector<1x256xf32>
    %403 = tpu.matmul %400, %402, %cst_181 {dimension_numbers = #tpu.dot_dimension_numbers<[1], [0], [0], [1], [0, 0, 1, 1], [], []>} : vector<1x32xf32>, vector<32x256xf32>, vector<1x256xf32> -> vector<1x256xf32>
    %c2_182 = arith.constant 2 : index
    %c0_183 = arith.constant 0 : index
    %404 = vector.load %arg10[%c2_182, %c0_183] : memref<3x256xf32, #tpu.memory_space<vmem>>, vector<1x256xf32>
    %405 = arith.addf %403, %404 : vector<1x256xf32>
    %cst_184 = arith.constant 0.000000e+00 : f32
    %406 = vector.broadcast %cst_184 : f32 to vector<1x256xf32>
    %407 = arith.maximumf %405, %406 : vector<1x256xf32>
    %c2_185 = arith.constant 2 : index
    %c0_186 = arith.constant 0 : index
    %c0_187 = arith.constant 0 : index
    %408 = vector.load %arg8[%c2_185, %c0_186, %c0_187] : memref<3x256x32xf32, #tpu.memory_space<vmem>>, vector<1x256x32xf32>
    %409 = vector.shape_cast %408 : vector<1x256x32xf32> to vector<256x32xf32>
    %cst_188 = arith.constant dense<0.000000e+00> : vector<1x32xf32>
    %410 = tpu.matmul %407, %409, %cst_188 {dimension_numbers = #tpu.dot_dimension_numbers<[1], [0], [0], [1], [0, 0, 1, 1], [], []>} : vector<1x256xf32>, vector<256x32xf32>, vector<1x32xf32> -> vector<1x32xf32>
    %c35 = arith.constant 35 : index
    %c0_189 = arith.constant 0 : index
    %411 = vector.load %arg9[%c35, %c0_189] : memref<38x32xf32, #tpu.memory_space<vmem>>, vector<1x32xf32>
    %412 = arith.addf %410, %411 : vector<1x32xf32>
    %413 = arith.addf %400, %412 : vector<1x32xf32>
    %cst_190 = arith.constant dense<0.000000e+00> : vector<1xf32>
    %414 = vector.multi_reduction <add>, %413, %cst_190 [1] : vector<1x32xf32> to vector<1xf32>
    %415 = vector.shape_cast %414 : vector<1xf32> to vector<1x1xf32>
    %cst_191 = arith.constant 3.200000e+01 : f32
    %416 = vector.broadcast %cst_191 : f32 to vector<1x1xf32>
    %417 = arith.divf %415, %416 : vector<1x1xf32>
    %418 = vector.broadcast %417 : vector<1x1xf32> to vector<1x32xf32>
    %419 = arith.subf %413, %418 : vector<1x32xf32>
    %420 = vector.broadcast %417 : vector<1x1xf32> to vector<1x32xf32>
    %421 = arith.subf %413, %420 : vector<1x32xf32>
    %422 = arith.mulf %419, %421 : vector<1x32xf32>
    %cst_192 = arith.constant dense<0.000000e+00> : vector<1xf32>
    %423 = vector.multi_reduction <add>, %422, %cst_192 [1] : vector<1x32xf32> to vector<1xf32>
    %424 = vector.shape_cast %423 : vector<1xf32> to vector<1x1xf32>
    %cst_193 = arith.constant 3.200000e+01 : f32
    %425 = vector.broadcast %cst_193 : f32 to vector<1x1xf32>
    %426 = arith.divf %424, %425 : vector<1x1xf32>
    %427 = vector.broadcast %417 : vector<1x1xf32> to vector<1x32xf32>
    %428 = arith.subf %413, %427 : vector<1x32xf32>
    %cst_194 = arith.constant 9.99999974E-6 : f32
    %429 = vector.broadcast %cst_194 : f32 to vector<1x1xf32>
    %430 = arith.addf %426, %429 : vector<1x1xf32>
    %431 = math.rsqrt %430 : vector<1x1xf32>
    %432 = vector.broadcast %431 : vector<1x1xf32> to vector<1x32xf32>
    %433 = arith.mulf %428, %432 : vector<1x32xf32>
    %c36 = arith.constant 36 : index
    %c0_195 = arith.constant 0 : index
    %434 = vector.load %arg9[%c36, %c0_195] : memref<38x32xf32, #tpu.memory_space<vmem>>, vector<1x32xf32>
    %435 = arith.mulf %433, %434 : vector<1x32xf32>
    %c37 = arith.constant 37 : index
    %c0_196 = arith.constant 0 : index
    %436 = vector.load %arg9[%c37, %c0_196] : memref<38x32xf32, #tpu.memory_space<vmem>>, vector<1x32xf32>
    %437 = arith.addf %435, %436 : vector<1x32xf32>
    %c0_197 = arith.constant 0 : index
    %c0_198 = arith.constant 0 : index
    %c0_199 = arith.constant 0 : index
    %438 = vector.load %arg11[%c0_197, %c0_198, %c0_199] : memref<1x1x32xf32, #tpu.memory_space<vmem>>, vector<1x1x32xf32>
    %439 = vector.shape_cast %438 : vector<1x1x32xf32> to vector<1x32xf32>
    %440 = vector.shape_cast %437 : vector<1x32xf32> to vector<1x1x32xf32>
    tpu.vector_store %arg11[%c0_197, %c0_198, %c0_199], %440 {strides = array<i32>} : memref<1x1x32xf32, #tpu.memory_space<vmem>>, vector<1x1x32xf32>,
    return
  }
  func.func @transform_0(%arg0: i32) -> (i32, i32, i32) {
    %c0_i32 = arith.constant 0 : i32
    %c0_i32_0 = arith.constant 0 : i32
    %c0_i32_1 = arith.constant 0 : i32
    return %arg0, %c0_i32, %c0_i32_0 : i32, i32, i32
  }
  func.func @transform_1(%arg0: i32) -> (i32, i32) {
    %c0_i32 = arith.constant 0 : i32
    %c0_i32_0 = arith.constant 0 : i32
    %c0_i32_1 = arith.constant 0 : i32
    return %c0_i32, %c0_i32_0 : i32, i32
  }
  func.func @transform_2(%arg0: i32) -> (i32, i32) {
    %c0_i32 = arith.constant 0 : i32
    %c0_i32_0 = arith.constant 0 : i32
    %c0_i32_1 = arith.constant 0 : i32
    return %c0_i32, %c0_i32_0 : i32, i32
  }
  func.func @transform_3(%arg0: i32) -> (i32, i32, i32) {
    %c0_i32 = arith.constant 0 : i32
    %c0_i32_0 = arith.constant 0 : i32
    %c0_i32_1 = arith.constant 0 : i32
    %c0_i32_2 = arith.constant 0 : i32
    return %c0_i32, %c0_i32_0, %c0_i32_1 : i32, i32, i32
  }
  func.func @transform_4(%arg0: i32) -> (i32, i32, i32) {
    %c0_i32 = arith.constant 0 : i32
    %c0_i32_0 = arith.constant 0 : i32
    %c0_i32_1 = arith.constant 0 : i32
    %c0_i32_2 = arith.constant 0 : i32
    return %c0_i32, %c0_i32_0, %c0_i32_1 : i32, i32, i32
  }
  func.func @transform_5(%arg0: i32) -> (i32, i32, i32) {
    %c0_i32 = arith.constant 0 : i32
    %c0_i32_0 = arith.constant 0 : i32
    %c0_i32_1 = arith.constant 0 : i32
    %c0_i32_2 = arith.constant 0 : i32
    return %c0_i32, %c0_i32_0, %c0_i32_1 : i32, i32, i32
  }
  func.func @transform_6(%arg0: i32) -> (i32, i32, i32) {
    %c0_i32 = arith.constant 0 : i32
    %c0_i32_0 = arith.constant 0 : i32
    %c0_i32_1 = arith.constant 0 : i32
    %c0_i32_2 = arith.constant 0 : i32
    return %c0_i32, %c0_i32_0, %c0_i32_1 : i32, i32, i32
  }
  func.func @transform_7(%arg0: i32) -> (i32, i32, i32) {
    %c0_i32 = arith.constant 0 : i32
    %c0_i32_0 = arith.constant 0 : i32
    %c0_i32_1 = arith.constant 0 : i32
    %c0_i32_2 = arith.constant 0 : i32
    return %c0_i32, %c0_i32_0, %c0_i32_1 : i32, i32, i32
  }
  func.func @transform_8(%arg0: i32) -> (i32, i32) {
    %c0_i32 = arith.constant 0 : i32
    %c0_i32_0 = arith.constant 0 : i32
    %c0_i32_1 = arith.constant 0 : i32
    return %c0_i32, %c0_i32_0 : i32, i32
  }
  func.func @transform_9(%arg0: i32) -> (i32, i32) {
    %c0_i32 = arith.constant 0 : i32
    %c0_i32_0 = arith.constant 0 : i32
    %c0_i32_1 = arith.constant 0 : i32
    return %c0_i32, %c0_i32_0 : i32, i32
  }
  func.func @transform_10(%arg0: i32) -> (i32, i32, i32) {
    %c0_i32 = arith.constant 0 : i32
    %c0_i32_0 = arith.constant 0 : i32
    %c0_i32_1 = arith.constant 0 : i32
    return %arg0, %c0_i32, %c0_i32_0 : i32, i32, i32
  }
}

</mosaic_0001>

<bundles_post_ra>
// kernel: st_encoder_forward.1
= control target key start
LH: loop header
LB: loop body
LE: loop exit
PB: predicated region body
PF: predicated region fallthrough
CT: control target
= control target key end

     0   :  { %s4258_s13 = smov 0   ;;  %s5143_s0 = inlined_call_operand.vmem [shape: f32[2,8,4], index: 0, kind: input, shape index: {}]   ;;  %s5144_s1 = inlined_call_operand.vmem [shape: f32[8,32], index: 1, kind: input, shape index: {}]   ;;  %s5145_s2 = inlined_call_operand.vmem [shape: f32[4,32], index: 2, kind: input, shape index: {}]   ;;  %s5146_s3 = inlined_call_operand.vmem [shape: f32[2,64,32], index: 3, kind: input, shape index: {}]   ;;  %s5147_s4 = inlined_call_operand.vmem [shape: f32[4,32,96], index: 4, kind: input, shape index: {}]   ;;  %s5148_s5 = inlined_call_operand.vmem [shape: f32[6,32,32], index: 5, kind: input, shape index: {}]   ;;  %s5149_s6 = inlined_call_operand.vmem [shape: f32[3,32,256], index: 6, kind: input, shape index: {}]   ;;  %s5150_s7 = inlined_call_operand.vmem [shape: f32[3,256,32], index: 7, kind: input, shape index: {}]   ;;  %s5151_s8 = inlined_call_operand.vmem [shape: f32[38,32], index: 8, kind: input, shape index: {}]   ;;  %s5152_s9 = inlined_call_operand.vmem [shape: f32[3,256], index: 9, kind: input, shape index: {}]   ;;  %s5153_s10 = inlined_call_operand.vmem [shape: f32[2,1,32], index: 10, kind: output, shape index: {}]  }
   0x1 LB: > { %s3308_s14 = sadd.s32 4294967295, %s4194_s13   ;;  %p3312_p0 = scmp.ge.s32.totalorder %s4194_s13, 1  ;;  %s4194_s13 = sphi %s4258_s13, %s20_s13  }
   0x2   : > { %p311_p1 = scmp.lt.s32.totalorder %s4194_s13, 3 }
   0x4   : > { %p312_p2 = pnand %p3312_p0, %p311_p1 }
   0x5   : > { %v360_v0 = vld [vmem:[%s5145_s2] sm:$0xf] (!%p312_p2)  ;;  %vm370_vm0 = vcmask (!%p312_p2), 1043456   ;;  %p346_p3 = scmp.lt.s32.totalorder (!%p312_p2), %s3308_s14, 1  ;;  %v4196_v1 = vmov (!%p312_p2), 0.0   ;;  %vm4197_vm1 = vmmov (!%p312_p2), 0  }
   0x6   : > { %315 = sbr.rel (%p312_p2) target bundleno = 10668 (0x29ac), region = 60  ;;  %3699 = vmatprep.subr.mxu0 (!%p312_p2), %v4196_v1  ;;  %3701 = vmatprep.mubr.msk.f32.mxu0 (!%p312_p2), %vm4197_vm1, %v4196_v1  ;;  %vm366_vm2 = vcmask (!%p312_p2), 31744   ;;  %v455_v3 = vld [vmem:[%s5146_s3] sm:$0xff] (!%p312_p2)  ;;  %v456_v4 = vld [vmem:[%s5146_s3 + $0x8] sm:$0xff] (!%p312_p2)  ;;  %v457_v5 = vld [vmem:[%s5146_s3 + $0x10] sm:$0xff] (!%p312_p2)  ;;  %v4198_v6 = vmov (!%p312_p2), 0.0|0.0  }
   0x7   : > { %3700 = vmatpush3.msk.msra.mxu0 (!%p312_p2), %vm370_vm0, %v360_v0  ;;  %3750 = vmatprep.mubr.msk.f32.mxu1 (!%p312_p2), %vm4197_vm1, %v4196_v1  ;;  %v3914_v7 = vpack.c.bf16 (!%p312_p2), %v456_v4, %v455_v3  ;;  %v458_v8 = vld [vmem:[%s5146_s3 + $0x18] sm:$0xff] (!%p312_p2)  ;;  %v459_v10 = vld [vmem:[%s5146_s3 + $0x20] sm:$0xff] (!%p312_p2)  ;;  %v460_v11 = vld [vmem:[%s5146_s3 + $0x28] sm:$0xff] (!%p312_p2)  ;;  %s4199_s21 = smov (!%p312_p2), 32   ;;  %vm448_vm3 = vcmask (!%p312_p2), 1040384   ;;  %vm453_vm4 = vcmask (!%p312_p2), 261120  }
   0x8   : > { %3913 = vmatprep.subr.bf16.mxu0 (!%p312_p2), %v4198_v6  ;;  %3937 = vmatprep.subr.bf16.mxu1 (!%p312_p2), %v4198_v6  ;;  %v3917_v9 = vpack.c.bf16 (!%p312_p2), %v458_v8, %v457_v5  ;;  %v3920_v12 = vpack.c.bf16 (!%p312_p2), %v460_v11, %v459_v10  ;;  %v461_v13 = vld [vmem:[%s5146_s3 + $0x30] sm:$0xff] (!%p312_p2)  ;;  %v462_v14 = vld [vmem:[%s5146_s3 + $0x38] sm:$0xff] (!%p312_p2)  ;;  %v3314_v16 = vld [vmem:[%s5151_s8] ss:$0 sm:$0xff] (!%p312_p2)  ;;  %vm468_vm5 = vcmask (!%p312_p2), 523264   ;;  %v354_v5 = vlaneseq (!%p312_p2) }
   0x9   : > { %v3923_v15 = vpack.c.bf16 (!%p312_p2), %v462_v14, %v461_v13  ;;  %v3319_v25 = vld [vmem:[%s5146_s3 + $0x40] sm:$0xff] (!%p312_p2)  ;;  %v3320_v26 = vld [vmem:[%s5146_s3 + $0x48] sm:$0xff] (!%p312_p2)  ;;  %v3321_v27 = vld [vmem:[%s5146_s3 + $0x50] sm:$0xff] (!%p312_p2)  ;;  %v4202_v10 = vmov (!%p312_p2), -1e+30   ;;  %vm824_vm7 = vcmask (!%p312_p2), 64512  }
   0xa   : > { %v3926_v28 = vpack.c.bf16 (!%p312_p2), %v3320_v26, %v3319_v25  ;;  %v3322_v29 = vld [vmem:[%s5146_s3 + $0x58] sm:$0xff] (!%p312_p2)  ;;  %v3323_v31 = vld [vmem:[%s5146_s3 + $0x60] sm:$0xff] (!%p312_p2)  ;;  %v3324_v32 = vld [vmem:[%s5146_s3 + $0x68] sm:$0xff] (!%p312_p2)  ;;  %v357_v8 = vand.u32 (!%p312_p2), 127, %v354_v5  ;;  %vm2550_vm8 = vcmask (!%p312_p2), 261127   ;;  %vm2835_vm9 = vcmask (!%p312_p2), 57344  }
   0xb   : > { %v3929_v30 = vpack.c.bf16 (!%p312_p2), %v3322_v29, %v3321_v27  ;;  %v3932_v33 = vpack.c.bf16 (!%p312_p2), %v3324_v32, %v3323_v31  ;;  %v3325_v34 = vld [vmem:[%s5146_s3 + $0x70] sm:$0xff] (!%p312_p2)  ;;  %v3326_v35 = vld [vmem:[%s5146_s3 + $0x78] sm:$0xff] (!%p312_p2)  ;;  %v3317_v37 = vld [vmem:[%s5151_s8 + $0x1] ss:$0 sm:$0xff] (!%p312_p2) }
   0xc   : > { %v3935_v36 = vpack.c.bf16 (!%p312_p2), %v3326_v35, %v3325_v34  ;;  %v641_v46 = vld [vmem:[%s5147_s4] sm:$0xff] (!%p312_p2)  ;;  %v642_v47 = vld [vmem:[%s5147_s4 + $0x8] sm:$0xff] (!%p312_p2)  ;;  %v643_v49 = vld [vmem:[%s5147_s4 + $0x10] sm:$0xff] (!%p312_p2) }
   0xd   : > { %s5155_s14 = smov (!%p346_p3, %s3308_s14), 1  ;;  %v3938_v48 = vpack.c.bf16 %v642_v47, %v641_v46  ;;  %v644_v50 = vld [vmem:[%s5147_s4 + $0x18] sm:$0xff]  ;;  %v3331_v52 = vld [vmem:[%s5151_s8 + $0x4] ss:$0 sm:$0xff]  ;;  %v3327_v53 = vld [vmem:[%s5151_s8 + $0x2] ss:$0 sm:$0xff] }
   0xe   : > { %s3313_s17 = sshll.u32 %s5155_s14, 3  ;;  %v3941_v51 = vpack.c.bf16 %v644_v50, %v643_v49  ;;  %730 = vrot.lane.b32.xlu1 %v3331_v52, %s4199_s21  ;;  %v3332_v0 = vld [vmem:[%s5151_s8 + $0x5] ss:$0 sm:$0xff]  ;;  %v1081_v46 = vld [vmem:[%s5148_s5 + $0x8] sm:$0xff]  ;;  %v1082_v47 = vld [vmem:[%s5148_s5 + $0x10] sm:$0xff] }
   0xf   : > { %s349_s20 = scalar_lea.vmem %s5143_s0, %s3313_s17  ;;  %3939 = vmatpush3.bf16.msra.mxu1 %v3938_v48  ;;  %s4200_s17 = smov 96   ;;  %v1083_v49 = vld [vmem:[%s5148_s5 + $0x18] sm:$0xff] }
  0x10   : > { %v353_v2 = vld [vmem:[%s349_s20] sm:$0xff]  ;;  %3940 = vmatprep.subr.bf16.mxu1 %v4198_v6  ;;  %s4201_s20 = smov 64   ;;  %v3947_v50 = vpack.c.bf16 %v1083_v49, %v1082_v47 }
  0x11   : > { %3702 = vmatmul.mubr.msk.f32.vlgmr.msra.gmra.mrb[0].mxu0 %vm366_vm2, %v353_v2  ;;  %v3330_v2 = vld [vmem:[%s5151_s8 + $0x3] ss:$0 sm:$0xff] }
  0x12   : > { %3720 = vmatprep.mubr.msk.f32.mxu0 %vm4197_vm1, %v4196_v1  ;;  %3915 = vmatpush3.bf16.msra.mxu0 %v3914_v7  ;;  %v4395_v7 = vshrl.u32 %v354_v5, 7  ;;  %v1163_v5 = vld [vmem:[%s5144_s1] sm:$0xff] }
  0x13   : > { %3916 = vmatprep.subr.bf16.mxu0 %v4198_v6  ;;  %3942 = vmatpush3.bf16.msra.mxu1 %v3941_v51 }
  0x14   : > { %3763 = vmatprep.subr.mxu1 %v4196_v1  ;;  %vm358_vm6 = vcmp.le.s32.totalorder %v357_v8, %v4395_v7 }
  0x15   : > { %v359_v11 = vsel %vm358_vm6, 0.0, %v4202_v10 }
  0x16   : > { %3918 = vmatpush3.bf16.msra.mxu0 %v3917_v9 }
  0x17   : > { %3919 = vmatprep.subr.bf16.mxu0 %v4198_v6 }
  0x1a   : > { %3921 = vmatpush3.bf16.msra.mxu0 %v3920_v12 }
  0x1b   : > { %3922 = vmatprep.subr.bf16.mxu0 %v4198_v6 }
  0x1e   : > { %3924 = vmatpush3.bf16.msra.mxu0 %v3923_v15 }
  0x1f   : > { %3925 = vmatprep.subr.bf16.mxu0 %v4198_v6 }
  0x80   : > { %v731_v60 = vpop.permute.xlu1 %730 }
  0xe4   : > { %v440_v17 = vpop.f32.mrb[0].mxu0 }
  0xe5   : > { %v441_v18 = vadd.f32 %v3314_v16, %v440_v17  ;;  %v3703_v19 = vpop.f32.mrb[1].mxu0 }
  0xe7   : > { %v444_v20 = vmax.f32 %v441_v18, 0.0 }
  0xe9   : > { %450 = vrot.lane.b32.xlu0 %v444_v20, %s4199_s21  ;;  %v446_v21 = vrot.slane %v444_v20, 7 }
  0xeb   : > { %v449_v23 = vsel %vm448_vm3, 0.0, %v446_v21 }
 0x15b   : > { %v451_v22 = vpop.permute.xlu0 %450 }
 0x15c   : > { %v454_v24 = vsel %vm453_vm4, %v449_v23, %v451_v22 }
 0x15d   : > { %3721 = vmatmul.mubr.msk.f32.vlgmr.msra.gmra.mrb[2].mxu0 %vm468_vm5, %v454_v24 }
 0x15e   : > { %3739 = vmatprep.mubr.msk.f32.mxu0 %vm4197_vm1, %v4196_v1  ;;  %3927 = vmatpush3.bf16.msra.mxu0 %v3926_v28 }
 0x15f   : > { %3928 = vmatprep.subr.bf16.mxu0 %v4198_v6 }
 0x162   : > { %3930 = vmatpush3.bf16.msra.mxu0 %v3929_v30 }
 0x163   : > { %3931 = vmatprep.subr.bf16.mxu0 %v4198_v6 }
 0x166   : > { %3933 = vmatpush3.bf16.msra.mxu0 %v3932_v33 }
 0x167   : > { %3934 = vmatprep.subr.bf16.mxu0 %v4198_v6 }
 0x16a   : > { %3936 = vmatpush3.bf16.msra.mxu0 %v3935_v36 }
 0x16b   : > { %3753 = vmatprep.subr.mxu0 %v4196_v1 }
 0x230   : > { %v538_v38 = vpop.f32.mrb[2].mxu0 }
 0x231   : > { %v539_v39 = vadd.f32 %v3317_v37, %v538_v38  ;;  %v3722_v40 = vpop.f32.mrb[3].mxu0 }
 0x233   : > { %v542_v41 = vmax.f32 %v539_v39, 0.0 }
 0x235   : > { %547 = vrot.lane.b32.xlu0 %v542_v41, %s4199_s21  ;;  %v544_v42 = vrot.slane %v542_v41, 7 }
 0x237   : > { %v546_v44 = vsel %vm448_vm3, 0.0, %v544_v42 }
 0x2a7   : > { %v548_v43 = vpop.permute.xlu0 %547 }
 0x2a8   : > { %v550_v45 = vsel %vm453_vm4, %v546_v44, %v548_v43 }
 0x2a9   : > { %3740 = vmatmul.mubr.msk.f32.vlgmr.msra.gmra.mrb[4].mxu0 %vm468_vm5, %v550_v45  ;;  %v1080_v45 = vld [vmem:[%s5148_s5] sm:$0xff] }
 0x2aa   : > { %3755 = vmatprep.mubr.msk.f32.mxu0 %vm4197_vm1, %v4196_v1  ;;  %v3944_v48 = vpack.c.bf16 %v1081_v46, %v1080_v45 }
 0x37c   : > { %v634_v54 = vpop.f32.mrb[4].mxu0 }
 0x37d   : > { %v635_v55 = vadd.f32 %v3327_v53, %v634_v54  ;;  %v3741_v56 = vpop.f32.mrb[5].mxu0 }
 0x37e   : > { %v3342_v56 = vld [vmem:[%s5147_s4 + $0x20] sm:$0xff] }
 0x37f   : > { %v638_v57 = vmax.f32 %v635_v55, 0.0 }
 0x381   : > { %v639_v58 = vadd.f32 %v638_v57, %v444_v20  ;;  %v3343_v57 = vld [vmem:[%s5147_s4 + $0x28] sm:$0xff] }
 0x383   : > { %v640_v59 = vmax.f32 %v639_v58, 0.0  ;;  %v3950_v58 = vpack.c.bf16 %v3343_v57, %v3342_v56  ;;  %v1551_v57 = vld [vmem:[%s5149_s6 + $0x28] sm:$0xff] }
 0x385   : > { %3751 = vmatmul.mubr.msk.f32.vlgmr.msra.gmra.mrb[0].mxu1 %vm453_vm4, %v640_v59 }
 0x386   : > { %3765 = vmatprep.mubr.msk.f32.mxu1 %vm4197_vm1, %v4196_v1 }
 0x458   : > { %v714_v61 = vpop.f32.mrb[0].mxu1 }
 0x459   : > { %v733_v62 = vadd.f32 %v731_v60, %v714_v61  ;;  %v3752_v63 = vpop.f32.mrb[1].mxu1  ;;  %v723_v4 = vadd.f32 %v3330_v2, %v714_v61  ;;  %v3345_v60 = vld [vmem:[%s5147_s4 + $0x38] sm:$0xff] }
 0x45a   : > { %v3349_v63 = vld [vmem:[%s5151_s8 + $0x9] ss:$0 sm:$0xff] }
 0x45b   : > { %745 = vrot.lane.b32.xlu1 %v733_v62, %s4200_s17  ;;  %v3348_v62 = vld [vmem:[%s5151_s8 + $0x8] ss:$0 sm:$0xff] }
 0x45f   : > { %740 = vrot.lane.b32.xlu1 %v3332_v0, %s4201_s20  ;;  %v3340_v0 = vld [vmem:[%s5151_s8 + $0x6] ss:$0 sm:$0xff] }
 0x4cd   : > { %v746_v3 = vpop.permute.xlu1 %745 }
 0x4ce   : > { %3754 = vmatpush3.xpose.msk.msra.mxu0 %vm453_vm4, %v746_v3 }
 0x4cf   : > { %3758 = vmatprep.subr.mxu0 %v4196_v1 }
 0x4d1   : > { %3756 = vmatmul.mubr.msk.f32.vlgmr.msra.gmra.mrb[6].mxu0 %vm453_vm4, %v723_v4  ;;  %v741_v16 = vpop.permute.xlu1 %740 }
 0x4d2   : > { %3760 = vmatprep.mubr.msk.f32.mxu0 %vm4197_vm1, %v4196_v1  ;;  %v743_v17 = vadd.f32 %v741_v16, %v714_v61 }
 0x5a4   : > { %v818_v9 = vpop.f32.mrb[6].mxu0 }
 0x5a5   : > { %v822_v12 = vmul.f32 0.17677669, %v818_v9  ;;  %v3757_v13 = vpop.f32.mrb[7].mxu0 }
 0x5a7   : > { %v823_v14 = vadd.f32 %v822_v12, %v359_v11 }
 0x5a9   : > { %v825_v15 = vsel %vm824_vm7, %v823_v14, -inf }
 0x5aa   : > { %826 = vmax.xlane.f32.xlu0 %v825_v15 }
 0x5c0   : > { %837 = vrot.lane.b32.xlu0 %v743_v17, %s4201_s20 }
 0x637   : > { %v827_v18 = vpop.xlane.xlu0 %826 }
 0x638   : > { %v828_v19 = vsub.f32 %v823_v14, %v827_v18  ;;  %v3347_v14 = vld [vmem:[%s5151_s8 + $0x7] ss:$0 sm:$0xff] }
 0x63a   : > { %v829_v20 = vmul.f32 1.442695, %v828_v19 }
 0x63b   : > { %v838_v21 = vpop.permute.xlu0 %837 }
 0x63c   : > { %4148 = vpow2.f32 %v829_v20  ;;  %3759 = vmatpush3.msra.mxu0 %v838_v21 }
 0x63d   : > { %3768 = vmatprep.subr.mxu0 %v4196_v1 }
 0x646   : > { %v4149_v22 = vpop.eup %4148 }
 0x647   : > { %v831_v23 = vsel %vm824_vm7, %v4149_v22, 0.0 }
 0x648   : > { %832 = vadd.xlane.f32.xlu1 %v831_v23 }
 0x6d5   : > { %v833_v24 = vpop.xlane.xlu1 %832 }
 0x6d6   : > { %4150 = vrcp.f32 %v833_v24 }
 0x6e0   : > { %v4151_v25 = vpop.eup %4150 }
 0x6e1   : > { %v835_v26 = vmul.f32 %v4151_v25, %v4149_v22 }
 0x6e3   : > { %3761 = vmatmul.mubr.msk.f32.vlgmr.msra.gmra.mrb[8].mxu0 %vm824_vm7, %v835_v26 }
 0x6e4   : > { %3770 = vmatprep.mubr.msk.f32.mxu0 %vm4197_vm1, %v4196_v1 }
 0x7b6   : > { %v909_v27 = vpop.f32.mrb[8].mxu0 }
 0x7b7   : > { %v913_v28 = vadd.f32 %v909_v27, %v640_v59  ;;  %v3762_v29 = vpop.f32.mrb[9].mxu0  ;;  %v3344_v59 = vld [vmem:[%s5147_s4 + $0x30] sm:$0xff] }
 0x7b8   : > { %v3953_v61 = vpack.c.bf16 %v3345_v60, %v3344_v59  ;;  %v3353_v29 = vld [vmem:[%s5148_s5 + $0x20] sm:$0xff] }
 0x7b9   : > { %v3336_v30 = vmul.f32 -1.442695, %v913_v28  ;;  %v1550_v60 = vld [vmem:[%s5149_s6 + $0x20] sm:$0xff] }
 0x7bb   : > { %4152 = vpow2.f32 %v3336_v30  ;;  %v3354_v30 = vld [vmem:[%s5148_s5 + $0x28] sm:$0xff] }
 0x7bc   : > { %4154 = vtanh.f32 %v913_v28 }
 0x7c5   : > { %v4153_v31 = vpop.eup %4152 }
 0x7c6   : > { %v918_v32 = vadd.f32 1.0, %v4153_v31  ;;  %v4155_v33 = vpop.eup %4154  ;;  %v3355_v31 = vld [vmem:[%s5148_s5 + $0x30] sm:$0xff] }
 0x7c8   : > { %4156 = vrcp.f32 %v918_v32  ;;  %v3956_v32 = vpack.c.bf16 %v3354_v30, %v3353_v29  ;;  %v1650_v29 = vld [vmem:[%s5150_s7 + $0x40] sm:$0xff]  ;;  %v1651_v30 = vld [vmem:[%s5150_s7 + $0x48] sm:$0xff] }
 0x7d2   : > { %v4157_v34 = vpop.eup %4156 }
 0x7d3   : > { %v921_v35 = vmul.f32 %v4157_v34, %v4155_v33  ;;  %v3356_v33 = vld [vmem:[%s5148_s5 + $0x38] sm:$0xff] }
 0x7d4   : > { %v3959_v34 = vpack.c.bf16 %v3356_v33, %v3355_v31  ;;  %v1668_v31 = vld [vmem:[%s5150_s7 + $0xd0] sm:$0xff]  ;;  %v3987_v33 = vpack.c.bf16 %v1651_v30, %v1650_v29 }
 0x7d5   : > { %3764 = vmatpush3.xpose.msk.msra.mxu1 %vm453_vm4, %v921_v35  ;;  %3769 = vmatpush3.msra.mxu0 %v921_v35 }
 0x7d6   : > { %3943 = vmatprep.subr.bf16.mxu1 %v4198_v6  ;;  %3949 = vmatprep.subr.bf16.mxu0 %v4198_v6 }
 0x7d8   : > { %3766 = vmatmul.mubr.msk.f32.vlgmr.msra.gmra.mrb[2].mxu1 %vm453_vm4, %v921_v35 }
 0x7d9   : > { %3781 = vmatprep.mubr.msk.f32.mxu1 %vm4197_vm1, %v4196_v1  ;;  %3945 = vmatpush3.bf16.msra.mxu1 %v3944_v48 }
 0x7da   : > { %3946 = vmatprep.subr.bf16.mxu1 %v4198_v6 }
 0x7dd   : > { %3948 = vmatpush3.bf16.msra.mxu1 %v3947_v50 }
 0x7de   : > { %3795 = vmatprep.subr.mxu1 %v4196_v1 }
 0x8ab   : > { %v991_v36 = vpop.f32.mrb[2].mxu1 }
 0x8ac   : > { %v995_v37 = vmul.f32 0.17677669, %v991_v36  ;;  %v3767_v38 = vpop.f32.mrb[3].mxu1 }
 0x8ae   : > { %v996_v39 = vsel %vm824_vm7, %v995_v37, -inf }
 0x8af   : > { %997 = vmax.xlane.f32.xlu1 %v996_v39 }
 0x93c   : > { %v998_v40 = vpop.xlane.xlu1 %997 }
 0x93d   : > { %v999_v41 = vsub.f32 %v995_v37, %v998_v40  ;;  %v3357_v40 = vld [vmem:[%s5151_s8 + $0xa] ss:$0 sm:$0xff] }
 0x93f   : > { %v1000_v42 = vmul.f32 1.442695, %v999_v41 }
 0x941   : > { %4158 = vpow2.f32 %v1000_v42 }
 0x94b   : > { %v4159_v43 = vpop.eup %4158 }
 0x94c   : > { %v1002_v44 = vsel %vm824_vm7, %v4159_v43, 0.0 }
 0x94d   : > { %1003 = vadd.xlane.f32.xlu1 %v1002_v44 }
 0x95e   : > { %1255 = vrot.lane.b32.xlu1 %v3348_v62, %s4199_s21 }
 0x962   : > { %1265 = vrot.lane.b32.xlu1 %v3349_v63, %s4201_s20  ;;  %v1658_v63 = vld [vmem:[%s5150_s7 + $0x80] sm:$0xff] }
 0x9da   : > { %v1004_v51 = vpop.xlane.xlu1 %1003 }
 0x9db   : > { %4160 = vrcp.f32 %v1004_v51  ;;  %v1547_v51 = vld [vmem:[%s5149_s6 + $0x8] sm:$0xff] }
 0x9de   : > { %v1256_v10 = vpop.permute.xlu1 %1255 }
 0x9e2   : > { %v1266_v21 = vpop.permute.xlu1 %1265 }
 0x9e5   : > { %v4161_v52 = vpop.eup %4160 }
 0x9e6   : > { %v1006_v53 = vmul.f32 %v4161_v52, %v4159_v43  ;;  %v1549_v52 = vld [vmem:[%s5149_s6 + $0x18] sm:$0xff] }
 0x9e8   : > { %3771 = vmatmul.mubr.msk.f32.vlgmr.msra.gmra.mrb[10].mxu0 %vm824_vm7, %v1006_v53  ;;  %v3961_v53 = vpack.c.bf16 %v1549_v52, %v1547_v51  ;;  %v1654_v51 = vld [vmem:[%s5150_s7 + $0x60] sm:$0xff]  ;;  %v1655_v52 = vld [vmem:[%s5150_s7 + $0x68] sm:$0xff] }
 0x9e9   : > { %3792 = vmatprep.mubr.msk.f32.mxu0 %vm4197_vm1, %v4196_v1  ;;  %3951 = vmatpush3.bf16.msra.mxu0 %v3950_v58  ;;  %v1553_v58 = vld [vmem:[%s5149_s6 + $0x38] sm:$0xff] }
 0x9ea   : > { %3952 = vmatprep.subr.bf16.mxu0 %v4198_v6  ;;  %v3965_v59 = vpack.c.bf16 %v1553_v58, %v1551_v57  ;;  %v1657_v57 = vld [vmem:[%s5150_s7 + $0x78] sm:$0xff] }
 0x9ed   : > { %3954 = vmatpush3.bf16.msra.mxu0 %v3953_v61  ;;  %v1552_v61 = vld [vmem:[%s5149_s6 + $0x30] sm:$0xff] }
 0x9ee   : > { %3800 = vmatprep.subr.mxu0 %v4196_v1  ;;  %v3967_v62 = vpack.c.bf16 %v1552_v61, %v1550_v60  ;;  %v1554_v60 = vld [vmem:[%s5152_s9] ss:$4 sm:$0x3]  ;;  %v4639_v61 = vsub.s32 1, %v4395_v7 }
 0xabb   : > { %v1076_v54 = vpop.f32.mrb[10].mxu0 }
 0xabc   : > { %v3772_v55 = vpop.f32.mrb[11].mxu0  ;;  %3782 = vmatmul.mubr.msk.f32.vlgmr.msra.gmra.mrb[4].mxu1 %vm453_vm4, %v1076_v54  ;;  %v1546_v54 = vld [vmem:[%s5149_s6] sm:$0xff] }
 0xabd   : > { %3797 = vmatprep.mubr.msk.f32.mxu1 %vm4197_vm1, %v4196_v1  ;;  %v1548_v55 = vld [vmem:[%s5149_s6 + $0x10] sm:$0xff] }
 0xabe   : > { %v3963_v56 = vpack.c.bf16 %v1548_v55, %v1546_v54  ;;  %v1673_v54 = vld [vmem:[%s5150_s7 + $0xf8] sm:$0xff] }
 0xb8f   : > { %v1158_v2 = vpop.f32.mrb[4].mxu1 }
 0xb90   : > { %v1159_v3 = vadd.f32 %v3340_v0, %v1158_v2  ;;  %v3783_v4 = vpop.f32.mrb[5].mxu1  ;;  %v1659_v0 = vld [vmem:[%s5150_s7 + $0x88] sm:$0xff]  ;;  %v1642_v2 = vld [vmem:[%s5150_s7] sm:$0xff] }
 0xb91   : > { %v1643_v4 = vld [vmem:[%s5150_s7 + $0x8] sm:$0xff] }
 0xb92   : > { %v1162_v8 = vmax.f32 %v1159_v3, 0.0  ;;  %v3969_v3 = vpack.c.bf16 %v1659_v0, %v1658_v63  ;;  %v1563_v63 = vrot.slane %v1554_v60, %v4639_v61 }
 0xb94   : > { %v1164_v9 = vadd.f32 %v1163_v5, %v1162_v8  ;;  %v1660_v5 = vld [vmem:[%s5150_s7 + $0x90] sm:$0xff]  ;;  %v1661_v8 = vld [vmem:[%s5150_s7 + $0x98] sm:$0xff] }
 0xb96   : > { %3793 = vmatmul.mubr.msk.f32.vlgmr.msra.gmra.mrb[12].mxu0 %vm453_vm4, %v1164_v9 }
 0xb97   : > { %3802 = vmatprep.mubr.msk.f32.mxu0 %vm4197_vm1, %v4196_v1 }
 0xc69   : > { %v1239_v11 = vpop.f32.mrb[12].mxu0 }
 0xc6a   : > { %v1258_v12 = vadd.f32 %v1256_v10, %v1239_v11  ;;  %v3794_v13 = vpop.f32.mrb[13].mxu0  ;;  %v1248_v16 = vadd.f32 %v3347_v14, %v1239_v11  ;;  %v1268_v22 = vadd.f32 %v1266_v21, %v1239_v11  ;;  %v3973_v10 = vpack.c.bf16 %v1661_v8, %v1660_v5  ;;  %v1644_v11 = vld [vmem:[%s5150_s7 + $0x10] sm:$0xff]  ;;  %v1663_v14 = vld [vmem:[%s5150_s7 + $0xa8] sm:$0xff] }
 0xc6b   : > { %v1662_v13 = vld [vmem:[%s5150_s7 + $0xa0] sm:$0xff] }
 0xc6c   : > { %1270 = vrot.lane.b32.xlu0 %v1258_v12, %s4200_s17  ;;  %v1645_v12 = vld [vmem:[%s5150_s7 + $0x18] sm:$0xff] }
 0xcde   : > { %v1271_v15 = vpop.permute.xlu0 %1270 }
 0xcdf   : > { %3796 = vmatpush3.xpose.msk.msra.mxu1 %vm453_vm4, %v1271_v15  ;;  %v3975_v15 = vpack.c.bf16 %v1645_v12, %v1644_v11 }
 0xce0   : > { %3955 = vmatprep.subr.bf16.mxu1 %v4198_v6 }
 0xce2   : > { %3798 = vmatmul.mubr.msk.f32.vlgmr.msra.gmra.mrb[6].mxu1 %vm453_vm4, %v1248_v16  ;;  %v3977_v16 = vpack.c.bf16 %v1663_v14, %v1662_v13 }
 0xce3   : > { %3813 = vmatprep.mubr.msk.f32.mxu1 %vm4197_vm1, %v4196_v1  ;;  %3957 = vmatpush3.bf16.msra.mxu1 %v3956_v32  ;;  %v1669_v32 = vld [vmem:[%s5150_s7 + $0xd8] sm:$0xff] }
 0xce4   : > { %3958 = vmatprep.subr.bf16.mxu1 %v4198_v6 }
 0xce7   : > { %3960 = vmatpush3.bf16.msra.mxu1 %v3959_v34  ;;  %v3989_v34 = vpack.c.bf16 %v1669_v32, %v1668_v31  ;;  %v3363_v32 = vld [vmem:[%s5151_s8 + $0xe] ss:$0 sm:$0xff] }
 0xce8   : > { %3970 = vmatprep.subr.bf16.mxu1 %v3969_v3 }
 0xdb5   : > { %v1343_v17 = vpop.f32.mrb[6].mxu1 }
 0xdb6   : > { %v1347_v18 = vmul.f32 0.17677669, %v1343_v17  ;;  %v3799_v19 = vpop.f32.mrb[7].mxu1  ;;  %v1646_v17 = vld [vmem:[%s5150_s7 + $0x20] sm:$0xff] }
 0xdb7   : > { %v1664_v19 = vld [vmem:[%s5150_s7 + $0xb0] sm:$0xff] }
 0xdb8   : > { %v1348_v20 = vsel %vm824_vm7, %v1347_v18, -inf }
 0xdb9   : > { %1349 = vmax.xlane.f32.xlu0 %v1348_v20  ;;  %v1665_v20 = vld [vmem:[%s5150_s7 + $0xb8] sm:$0xff] }
 0xdcf   : > { %1360 = vrot.lane.b32.xlu0 %v1268_v22, %s4201_s20  ;;  %v3981_v22 = vpack.c.bf16 %v1665_v20, %v1664_v19  ;;  %v3365_v20 = vld [vmem:[%s5147_s4 + $0x40] sm:$0xff] }
 0xe46   : > { %v1350_v23 = vpop.xlane.xlu0 %1349 }
 0xe47   : > { %v1351_v24 = vsub.f32 %v1347_v18, %v1350_v23  ;;  %v1647_v18 = vld [vmem:[%s5150_s7 + $0x28] sm:$0xff]  ;;  %v1648_v23 = vld [vmem:[%s5150_s7 + $0x30] sm:$0xff] }
 0xe48   : > { %v3979_v21 = vpack.c.bf16 %v1647_v18, %v1646_v17 }
 0xe49   : > { %v1352_v25 = vmul.f32 1.442695, %v1351_v24  ;;  %v1649_v24 = vld [vmem:[%s5150_s7 + $0x38] sm:$0xff] }
 0xe4a   : > { %v1361_v26 = vpop.permute.xlu0 %1360 }
 0xe4b   : > { %4162 = vpow2.f32 %v1352_v25  ;;  %3801 = vmatpush3.msra.mxu0 %v1361_v26  ;;  %v1666_v25 = vld [vmem:[%s5150_s7 + $0xc0] sm:$0xff]  ;;  %v1667_v26 = vld [vmem:[%s5150_s7 + $0xc8] sm:$0xff] }
 0xe4c   : > { %3962 = vmatprep.subr.bf16.mxu0 %v3961_v53  ;;  %v1672_v53 = vld [vmem:[%s5150_s7 + $0xf0] sm:$0xff] }
 0xe4d   : > { %v3997_v55 = vpack.c.bf16 %v1673_v54, %v1672_v53 }
 0xe55   : > { %v4163_v27 = vpop.eup %4162 }
 0xe56   : > { %v1354_v28 = vsel %vm824_vm7, %v4163_v27, 0.0 }
 0xe57   : > { %1355 = vadd.xlane.f32.xlu1 %v1354_v28  ;;  %v3985_v28 = vpack.c.bf16 %v1667_v26, %v1666_v25  ;;  %v3372_v26 = vld [vmem:[%s5151_s8 + $0x12] ss:$0 sm:$0xff] }
 0xee4   : > { %v1356_v35 = vpop.xlane.xlu1 %1355 }
 0xee5   : > { %4164 = vrcp.f32 %v1356_v35  ;;  %v1652_v35 = vld [vmem:[%s5150_s7 + $0x50] sm:$0xff] }
 0xeef   : > { %v4165_v36 = vpop.eup %4164 }
 0xef0   : > { %v1358_v37 = vmul.f32 %v4165_v36, %v4163_v27  ;;  %v3983_v27 = vpack.c.bf16 %v1649_v24, %v1648_v23  ;;  %v1653_v36 = vld [vmem:[%s5150_s7 + $0x58] sm:$0xff]  ;;  %v3367_v23 = vld [vmem:[%s5147_s4 + $0x50] sm:$0xff] }
 0xef1   : > { %v3368_v24 = vld [vmem:[%s5147_s4 + $0x58] sm:$0xff] }
 0xef2   : > { %3803 = vmatmul.mubr.msk.f32.vlgmr.msra.gmra.mrb[14].mxu0 %vm824_vm7, %v1358_v37  ;;  %v1670_v37 = vld [vmem:[%s5150_s7 + $0xe0] sm:$0xff]  ;;  %v4005_v25 = vpack.c.bf16 %v3368_v24, %v3367_v23  ;;  %v3389_v24 = vld [vmem:[%s5149_s6 + $0x68] sm:$0xff] }
 0xef3   : > { %1633 = vmatprep.mubr.f32.mxu0 %v4196_v1  ;;  %3964 = vmatpush1.bf16.msra.mxu0 %v3963_v56  ;;  %v1656_v56 = vld [vmem:[%s5150_s7 + $0x70] sm:$0xff] }
 0xef4   : > { %3966 = vmatprep.subr.bf16.mxu0 %v3965_v59  ;;  %v3999_v58 = vpack.c.bf16 %v1657_v57, %v1656_v56  ;;  %v4633_v59 = vsub.s32 0, %v4395_v7  ;;  %v3376_v57 = vld [vmem:[%s5148_s5 + $0x40] sm:$0xff] }
 0xef7   : > { %3968 = vmatpush1.bf16.msra.mxu0 %v3967_v62  ;;  %v1559_v62 = vrot.slane %v1554_v60, %v4633_v59 }
 0xef8   : > { %4001 = vmatprep.subr.bf16.mxu0 %v4198_v6 }
 0xfc5   : > { %v1432_v38 = vpop.f32.mrb[14].mxu0 }
 0xfc6   : > { %v3804_v39 = vpop.f32.mrb[15].mxu0  ;;  %3814 = vmatmul.mubr.msk.f32.vlgmr.msra.gmra.mrb[8].mxu1 %vm453_vm4, %v1432_v38  ;;  %v1671_v38 = vld [vmem:[%s5150_s7 + $0xe8] sm:$0xff] }
 0xfc7   : > { %v3991_v39 = vpack.c.bf16 %v1653_v36, %v1652_v35 }
0x1099   : > { %v1515_v41 = vpop.f32.mrb[8].mxu1 }
0x109a   : > { %v1516_v42 = vadd.f32 %v3357_v40, %v1515_v41  ;;  %v3815_v43 = vpop.f32.mrb[9].mxu1  ;;  %v3993_v40 = vpack.c.bf16 %v1671_v38, %v1670_v37 }
0x109c   : > { %v1519_v44 = vadd.f32 %v1516_v42, %v1164_v9  ;;  %v3971_v9 = vpack.c.bf16 %v1643_v4, %v1642_v2 }
0x109e   : > { %v1520_v45 = vsel %vm453_vm4, %v1519_v44, 0.0  ;;  %3972 = vmatpush3.bf16.msra.mxu1 %v3971_v9 }
0x109f   : > { %1521 = vadd.xlane.f32.xlu1 %v1520_v45  ;;  %3974 = vmatprep.subr.bf16.mxu1 %v3973_v10  ;;  %v3359_v45 = vld [vmem:[%s5151_s8 + $0xb] ss:$0 sm:$0xff]  ;;  %v3362_v10 = vld [vmem:[%s5151_s8 + $0xd] ss:$0 sm:$0xff] }
0x10a2   : > { %3976 = vmatpush3.bf16.msra.mxu1 %v3975_v15 }
0x10a3   : > { %3978 = vmatprep.subr.bf16.mxu1 %v3977_v16 }
0x10a6   : > { %3980 = vmatpush3.bf16.msra.mxu1 %v3979_v21  ;;  %v3366_v21 = vld [vmem:[%s5147_s4 + $0x48] sm:$0xff] }
0x10a7   : > { %3982 = vmatprep.subr.bf16.mxu1 %v3981_v22  ;;  %v4002_v22 = vpack.c.bf16 %v3366_v21, %v3365_v20  ;;  %v3384_v21 = vld [vmem:[%s5149_s6 + $0x40] sm:$0xff] }
0x10aa   : > { %3984 = vmatpush3.bf16.msra.mxu1 %v3983_v27  ;;  %v3371_v27 = vld [vmem:[%s5151_s8 + $0x11] ss:$0 sm:$0xff] }
0x10ab   : > { %3986 = vmatprep.subr.bf16.mxu1 %v3985_v28 }
0x10ae   : > { %3988 = vmatpush3.bf16.msra.mxu1 %v3987_v33 }
0x10af   : > { %3990 = vmatprep.subr.bf16.mxu1 %v3989_v34  ;;  %v3364_v34 = vld [vmem:[%s5151_s8 + $0xf] ss:$0 sm:$0xff] }
0x10b2   : > { %3992 = vmatpush3.bf16.msra.mxu1 %v3991_v39 }
0x10b3   : > { %3994 = vmatprep.subr.bf16.mxu1 %v3993_v40 }
0x112c   : > { %v1522_v46 = vpop.xlane.xlu1 %1521 }
0x112d   : > { %v1524_v47 = vmul.f32 0.03125, %v1522_v46 }
0x112f   : > { %v4496_v48 = vsub.f32 %v1519_v44, %v1524_v47  ;;  %v3360_v47 = vld [vmem:[%s5151_s8 + $0xc] ss:$0 sm:$0xff] }
0x1131   : > { %v1526_v49 = vmul.f32 %v4496_v48, %v4496_v48 }
0x1133   : > { %v1527_v50 = vsel %vm453_vm4, %v1526_v49, 0.0 }
0x1134   : > { %1528 = vadd.xlane.f32.xlu1 %v1527_v50 }
0x11c1   : > { %v1529_v41 = vpop.xlane.xlu1 %1528 }
0x11c2   : > { %v1530_v42 = vmul.f32 0.03125, %v1529_v41  ;;  %v3370_v41 = vld [vmem:[%s5151_s8 + $0x10] ss:$0 sm:$0xff] }
0x11c4   : > { %v1531_v43 = vadd.f32 1e-05, %v1530_v42 }
0x11c6   : > { %4166 = vrsqrt.f32 %v1531_v43 }
0x11d0   : > { %v4167_v44 = vpop.eup %4166 }
0x11d1   : > { %v1533_v46 = vmul.f32 %v4167_v44, %v4496_v48  ;;  %v3995_v48 = vpack.c.bf16 %v1655_v52, %v1654_v51 }
0x11d3   : > { %v1539_v49 = vmul.f32 %v3359_v45, %v1533_v46  ;;  %3996 = vmatpush3.bf16.msra.mxu1 %v3995_v48 }
0x11d4   : > { %3998 = vmatprep.subr.bf16.mxu1 %v3997_v55 }
0x11d5   : > { %v1545_v50 = vadd.f32 %v3360_v47, %v1539_v49 }
0x11d7   : > { %3361 = vmatmul.mubr.msk.f32.vlgmr.msra.gmra.mrb[16].mxu0 %vm453_vm4, %v1545_v50  ;;  %4000 = vmatpush3.bf16.msra.mxu1 %v3999_v58  ;;  %v3377_v58 = vld [vmem:[%s5148_s5 + $0x48] sm:$0xff] }
0x11d8   : > { %3824 = vmatprep.mubr.msk.f32.mxu0 %vm4197_vm1, %v4196_v1  ;;  %4003 = vmatpush3.bf16.msra.mxu0 %v4002_v22  ;;  %v3386_v22 = vld [vmem:[%s5149_s6 + $0x50] sm:$0xff] }
0x11d9   : > { %4004 = vmatprep.subr.bf16.mxu0 %v4198_v6  ;;  %v4015_v23 = vpack.c.bf16 %v3386_v22, %v3384_v21  ;;  %v3424_v21 = vld [vmem:[%s5150_s7 + $0x1f0] sm:$0xff]  ;;  %v3425_v22 = vld [vmem:[%s5150_s7 + $0x1f8] sm:$0xff] }
0x11dc   : > { %4006 = vmatpush3.bf16.msra.mxu0 %v4005_v25  ;;  %v3391_v25 = vld [vmem:[%s5149_s6 + $0x78] sm:$0xff] }
0x11dd   : > { %3827 = vmatprep.subr.mxu0 %v4196_v1 }
0x12aa   : > { %v1635_v0 = vpop.f32.mrb[16].mxu0 }
0x12ab   : > { %v1636_v2 = vadd.f32 %v1635_v0, %v1559_v62  ;;  %v1637_v3 = vpop.f32.mrb[17].mxu0  ;;  %v4008_v62 = vpack.c.bf16 %v3377_v58, %v3376_v57  ;;  %v3378_v0 = vld [vmem:[%s5148_s5 + $0x50] sm:$0xff]  ;;  %v3402_v57 = vld [vmem:[%s5150_s7 + $0x140] sm:$0xff]  ;;  %v3403_v58 = vld [vmem:[%s5150_s7 + $0x148] sm:$0xff] }
0x12ac   : > { %v1638_v4 = vadd.f32 %v1637_v3, %v1563_v63 }
0x12ad   : > { %v1640_v8 = vmax.f32 %v1636_v2, 0.0  ;;  %v3379_v2 = vld [vmem:[%s5148_s5 + $0x58] sm:$0xff] }
0x12ae   : > { %v1641_v5 = vmax.f32 %v1638_v4, 0.0  ;;  %v4011_v3 = vpack.c.bf16 %v3379_v2, %v3378_v0  ;;  %v3404_v2 = vld [vmem:[%s5150_s7 + $0x150] sm:$0xff] }
0x12b0   : > { %1743 = vmatprep.mubr.f32.mxu1 %v1641_v5 }
0x12b1   : > { %1744 = vmatmul.mubr.f32.vlgmr.msra.gmra.mrb[10].mxu1 %v1640_v8  ;;  %v3380_v8 = vld [vmem:[%s5151_s8 + $0x13] ss:$0 sm:$0xff] }
0x1384   : > { %v3583_v9 = vpop.f32.mrb[10].mxu1 }
0x1385   : > { %v3584_v11 = vpop.f32.mrb[11].mxu1 }
0x1386   : > { %v3585_v7 = vadd.f32 %v3584_v11, %v3583_v9 }
0x1388   : > { %v1746_v12 = vadd.f32 %v3585_v7, %v3362_v10 }
0x138a   : > { %v1749_v13 = vadd.f32 %v1746_v12, %v1545_v50 }
0x138c   : > { %v1750_v14 = vsel %vm453_vm4, %v1749_v13, 0.0 }
0x138d   : > { %1751 = vadd.xlane.f32.xlu0 %v1750_v14 }
0x13a3   : > { %1875 = vrot.lane.b32.xlu0 %v3372_v26, %s4201_s20  ;;  %v4017_v26 = vpack.c.bf16 %v3391_v25, %v3389_v24  ;;  %v3408_v24 = vld [vmem:[%s5150_s7 + $0x170] sm:$0xff]  ;;  %v3409_v25 = vld [vmem:[%s5150_s7 + $0x178] sm:$0xff] }
0x141a   : > { %v1752_v15 = vpop.xlane.xlu0 %1751 }
0x141b   : > { %v1753_v16 = vmul.f32 0.03125, %v1752_v15 }
0x141d   : > { %v1754_v17 = vsub.f32 %v1749_v13, %v1753_v16 }
0x141e   : > { %v1876_v49 = vpop.permute.xlu0 %1875 }
0x141f   : > { %v1755_v18 = vmul.f32 %v1754_v17, %v1754_v17 }
0x1421   : > { %v1756_v19 = vsel %vm453_vm4, %v1755_v18, 0.0  ;;  %v3385_v18 = vld [vmem:[%s5149_s6 + $0x48] sm:$0xff] }
0x1422   : > { %1757 = vadd.xlane.f32.xlu1 %v1756_v19  ;;  %v3387_v19 = vld [vmem:[%s5149_s6 + $0x58] sm:$0xff] }
0x1423   : > { %v4013_v20 = vpack.c.bf16 %v3387_v19, %v3385_v18  ;;  %v3406_v19 = vld [vmem:[%s5150_s7 + $0x160] sm:$0xff] }
0x1433   : > { %1865 = vrot.lane.b32.xlu1 %v3371_v27, %s4199_s21  ;;  %v3388_v27 = vld [vmem:[%s5149_s6 + $0x60] sm:$0xff] }
0x14af   : > { %v1758_v28 = vpop.xlane.xlu1 %1757 }
0x14b0   : > { %v1759_v29 = vmul.f32 0.03125, %v1758_v28  ;;  %v3390_v28 = vld [vmem:[%s5149_s6 + $0x70] sm:$0xff] }
0x14b2   : > { %v1760_v30 = vadd.f32 1e-05, %v1759_v29  ;;  %v4019_v29 = vpack.c.bf16 %v3390_v28, %v3388_v27  ;;  %v3392_v27 = vld [vmem:[%s5152_s9 + $0x1] ss:$4 sm:$0x3] }
0x14b3   : > { %v1866_v37 = vpop.permute.xlu1 %1865  ;;  %v2170_v28 = vrot.slane %v3392_v27, %v4633_v59 }
0x14b4   : > { %4168 = vrsqrt.f32 %v1760_v30  ;;  %v3410_v30 = vld [vmem:[%s5150_s7 + $0x180] sm:$0xff] }
0x14be   : > { %v4169_v31 = vpop.eup %4168 }
0x14bf   : > { %v1762_v33 = vmul.f32 %v4169_v31, %v1754_v17  ;;  %v3411_v31 = vld [vmem:[%s5150_s7 + $0x188] sm:$0xff] }
0x14c1   : > { %v1768_v35 = vmul.f32 %v3363_v32, %v1762_v33  ;;  %v3394_v32 = vld [vmem:[%s5150_s7 + $0x100] sm:$0xff]  ;;  %v4021_v33 = vpack.c.bf16 %v3411_v31, %v3410_v30 }
0x14c3   : > { %v1774_v36 = vadd.f32 %v3364_v34, %v1768_v35  ;;  %v3395_v34 = vld [vmem:[%s5150_s7 + $0x108] sm:$0xff]  ;;  %v3412_v35 = vld [vmem:[%s5150_s7 + $0x190] sm:$0xff]  ;;  %4022 = vmatprep.subr.bf16.mxu1 %v4021_v33 }
0x14c5   : > { %3825 = vmatmul.mubr.msk.f32.vlgmr.msra.gmra.mrb[18].mxu0 %vm453_vm4, %v1774_v36 }
0x14c6   : > { %3829 = vmatprep.mubr.msk.f32.mxu0 %vm4197_vm1, %v4196_v1 }
0x1598   : > { %v1849_v38 = vpop.f32.mrb[18].mxu0 }
0x1599   : > { %v1868_v39 = vadd.f32 %v1866_v37, %v1849_v38  ;;  %v3826_v40 = vpop.f32.mrb[19].mxu0  ;;  %v1858_v43 = vadd.f32 %v3370_v41, %v1849_v38  ;;  %v1878_v50 = vadd.f32 %v1876_v49, %v1849_v38  ;;  %v4023_v37 = vpack.c.bf16 %v3395_v34, %v3394_v32  ;;  %v3414_v41 = vld [vmem:[%s5150_s7 + $0x1a0] sm:$0xff]  ;;  %v3417_v49 = vld [vmem:[%s5150_s7 + $0x1b8] sm:$0xff] }
0x159a   : > { %v3397_v40 = vld [vmem:[%s5150_s7 + $0x118] sm:$0xff] }
0x159b   : > { %1880 = vrot.lane.b32.xlu1 %v1868_v39, %s4200_s17  ;;  %v3396_v39 = vld [vmem:[%s5150_s7 + $0x110] sm:$0xff]  ;;  %4024 = vmatpush3.bf16.msra.mxu1 %v4023_v37 }
0x159c   : > { %v3426_v37 = vld [vmem:[%s5151_s8 + $0x16] ss:$0 sm:$0xff] }
0x160d   : > { %v1881_v42 = vpop.permute.xlu1 %1880 }
0x160e   : > { %3828 = vmatpush3.xpose.msk.msra.mxu0 %vm453_vm4, %v1881_v42  ;;  %v3415_v42 = vld [vmem:[%s5150_s7 + $0x1a8] sm:$0xff] }
0x160f   : > { %3832 = vmatprep.subr.mxu0 %v4196_v1 }
0x1611   : > { %3830 = vmatmul.mubr.msk.f32.vlgmr.msra.gmra.mrb[20].mxu0 %vm453_vm4, %v1858_v43  ;;  %v4027_v43 = vpack.c.bf16 %v3397_v40, %v3396_v39 }
0x1612   : > { %3834 = vmatprep.mubr.msk.f32.mxu0 %vm4197_vm1, %v4196_v1 }
0x16e4   : > { %v1953_v44 = vpop.f32.mrb[20].mxu0 }
0x16e5   : > { %v1957_v45 = vmul.f32 0.17677669, %v1953_v44  ;;  %v3831_v46 = vpop.f32.mrb[21].mxu0  ;;  %v4029_v44 = vpack.c.bf16 %v3415_v42, %v3414_v41 }
0x16e6   : > { %v3399_v46 = vld [vmem:[%s5150_s7 + $0x128] sm:$0xff] }
0x16e7   : > { %v1958_v47 = vsel %vm824_vm7, %v1957_v45, -inf }
0x16e8   : > { %1959 = vmax.xlane.f32.xlu1 %v1958_v47  ;;  %v3416_v47 = vld [vmem:[%s5150_s7 + $0x1b0] sm:$0xff] }
0x16f9   : > { %1970 = vrot.lane.b32.xlu1 %v1878_v50, %s4201_s20 }
0x1775   : > { %v1960_v51 = vpop.xlane.xlu1 %1959 }
0x1776   : > { %v1961_v52 = vsub.f32 %v1957_v45, %v1960_v51  ;;  %v3398_v45 = vld [vmem:[%s5150_s7 + $0x120] sm:$0xff]  ;;  %v4033_v51 = vpack.c.bf16 %v3417_v49, %v3416_v47 }
0x1777   : > { %v4031_v50 = vpack.c.bf16 %v3399_v46, %v3398_v45  ;;  %v3429_v49 = vld [vmem:[%s5148_s5 + $0x60] sm:$0xff] }
0x1778   : > { %v1962_v48 = vmul.f32 1.442695, %v1961_v52  ;;  %v3400_v52 = vld [vmem:[%s5150_s7 + $0x130] sm:$0xff] }
0x1779   : > { %v1971_v53 = vpop.permute.xlu1 %1970 }
0x177a   : > { %4170 = vpow2.f32 %v1962_v48  ;;  %3833 = vmatpush3.msra.mxu0 %v1971_v53  ;;  %v3401_v48 = vld [vmem:[%s5150_s7 + $0x138] sm:$0xff]  ;;  %v3418_v53 = vld [vmem:[%s5150_s7 + $0x1c0] sm:$0xff] }
0x177b   : > { %4007 = vmatprep.subr.bf16.mxu0 %v4198_v6 }
0x1784   : > { %v4171_v54 = vpop.eup %4170 }
0x1785   : > { %v1964_v55 = vsel %vm824_vm7, %v4171_v54, 0.0 }
0x1786   : > { %1965 = vadd.xlane.f32.xlu0 %v1964_v55  ;;  %v4035_v55 = vpack.c.bf16 %v3401_v48, %v3400_v52  ;;  %v3431_v52 = vld [vmem:[%s5148_s5 + $0x70] sm:$0xff]  ;;  %v3432_v48 = vld [vmem:[%s5148_s5 + $0x78] sm:$0xff] }
0x1813   : > { %v1966_v56 = vpop.xlane.xlu0 %1965 }
0x1814   : > { %4172 = vrcp.f32 %v1966_v56 }
0x181e   : > { %v4173_v60 = vpop.eup %4172 }
0x181f   : > { %v1968_v63 = vmul.f32 %v4173_v60, %v4171_v54  ;;  %v3419_v54 = vld [vmem:[%s5150_s7 + $0x1c8] sm:$0xff]  ;;  %v3420_v60 = vld [vmem:[%s5150_s7 + $0x1d0] sm:$0xff] }
0x1820   : > { %v4037_v56 = vpack.c.bf16 %v3419_v54, %v3418_v53  ;;  %v4057_v53 = vpack.c.bf16 %v3432_v48, %v3431_v52 }
0x1821   : > { %3835 = vmatmul.mubr.msk.f32.vlgmr.msra.gmra.mrb[22].mxu0 %vm824_vm7, %v1968_v63  ;;  %v4039_v63 = vpack.c.bf16 %v3403_v58, %v3402_v57  ;;  %v3427_v58 = vld [vmem:[%s5151_s8 + $0x17] ss:$0 sm:$0xff] }
0x1822   : > { %4009 = vmatpush3.bf16.msra.mxu0 %v4008_v62  ;;  %3845 = vmatprep.mubr.msk.f32.mxu0 %vm4197_vm1, %v4196_v1  ;;  %v3421_v62 = vld [vmem:[%s5150_s7 + $0x1d8] sm:$0xff] }
0x1823   : > { %4010 = vmatprep.subr.bf16.mxu0 %v4198_v6  ;;  %v4041_v0 = vpack.c.bf16 %v3421_v62, %v3420_v60  ;;  %v3428_v62 = vld [vmem:[%s5151_s8 + $0x18] ss:$0 sm:$0xff] }
0x1826   : > { %4012 = vmatpush3.bf16.msra.mxu0 %v4011_v3  ;;  %v3405_v3 = vld [vmem:[%s5150_s7 + $0x158] sm:$0xff] }
0x1827   : > { %4014 = vmatprep.subr.bf16.mxu0 %v4013_v20  ;;  %v3407_v20 = vld [vmem:[%s5150_s7 + $0x168] sm:$0xff] }
0x18f4   : > { %v2042_v4 = vpop.f32.mrb[22].mxu0 }
0x18f5   : > { %v3836_v5 = vpop.f32.mrb[23].mxu0  ;;  %3846 = vmatmul.mubr.msk.f32.vlgmr.msra.gmra.mrb[24].mxu0 %vm453_vm4, %v2042_v4  ;;  %v3422_v4 = vld [vmem:[%s5150_s7 + $0x1e0] sm:$0xff] }
0x18f6   : > { %2244 = vmatprep.mubr.f32.mxu0 %v4196_v1  ;;  %4016 = vmatpush1.bf16.msra.mxu0 %v4015_v23  ;;  %v3423_v5 = vld [vmem:[%s5150_s7 + $0x1e8] sm:$0xff]  ;;  %v4049_v23 = vpack.c.bf16 %v3425_v22, %v3424_v21  ;;  %v3439_v21 = vld [vmem:[%s5147_s4 + $0x60] sm:$0xff] }
0x18f7   : > { %4018 = vmatprep.subr.bf16.mxu0 %v4017_v26  ;;  %v4051_v26 = vpack.c.bf16 %v3409_v25, %v3408_v24  ;;  %v3440_v22 = vld [vmem:[%s5147_s4 + $0x68] sm:$0xff]  ;;  %v3441_v25 = vld [vmem:[%s5147_s4 + $0x70] sm:$0xff] }
0x18f8   : > { %v4066_v24 = vpack.c.bf16 %v3440_v22, %v3439_v21 }
0x18fa   : > { %4020 = vmatpush1.bf16.msra.mxu0 %v4019_v29  ;;  %v2174_v29 = vrot.slane %v3392_v27, %v4639_v61 }
0x18fb   : > { %4053 = vmatprep.subr.bf16.mxu0 %v4198_v6 }
0x19c8   : > { %v2125_v9 = vpop.f32.mrb[24].mxu0 }
0x19c9   : > { %v2126_v10 = vadd.f32 %v3380_v8, %v2125_v9  ;;  %v3847_v11 = vpop.f32.mrb[25].mxu0  ;;  %v4043_v8 = vpack.c.bf16 %v3405_v3, %v3404_v2  ;;  %v4045_v9 = vpack.c.bf16 %v3423_v5, %v3422_v4  ;;  %v3435_v2 = vld [vmem:[%s5148_s5 + $0x88] sm:$0xff] }
0x19cb   : > { %v2129_v7 = vadd.f32 %v2126_v10, %v1774_v36  ;;  %v3413_v36 = vld [vmem:[%s5150_s7 + $0x198] sm:$0xff] }
0x19cc   : > { %v4025_v38 = vpack.c.bf16 %v3413_v36, %v3412_v35 }
0x19cd   : > { %v2130_v12 = vsel %vm453_vm4, %v2129_v7, 0.0 }
0x19ce   : > { %2131 = vadd.xlane.f32.xlu1 %v2130_v12  ;;  %4026 = vmatprep.subr.bf16.mxu1 %v4025_v38 }
0x19cf   : > { %4028 = vmatpush3.bf16.msra.mxu1 %v4027_v43 }
0x19d0   : > { %4030 = vmatprep.subr.bf16.mxu1 %v4029_v44 }
0x19d3   : > { %4032 = vmatpush3.bf16.msra.mxu1 %v4031_v50  ;;  %v3430_v50 = vld [vmem:[%s5148_s5 + $0x68] sm:$0xff] }
0x19d4   : > { %4034 = vmatprep.subr.bf16.mxu1 %v4033_v51  ;;  %v4054_v51 = vpack.c.bf16 %v3430_v50, %v3429_v49 }
0x19d7   : > { %4036 = vmatpush3.bf16.msra.mxu1 %v4035_v55 }
0x19d8   : > { %4038 = vmatprep.subr.bf16.mxu1 %v4037_v56 }
0x19db   : > { %4040 = vmatpush3.bf16.msra.mxu1 %v4039_v63 }
0x19dc   : > { %4042 = vmatprep.subr.bf16.mxu1 %v4041_v0  ;;  %v3434_v0 = vld [vmem:[%s5148_s5 + $0x80] sm:$0xff] }
0x19dd   : > { %v4060_v4 = vpack.c.bf16 %v3435_v2, %v3434_v0 }
0x19df   : > { %4044 = vmatpush3.bf16.msra.mxu1 %v4043_v8  ;;  %v3436_v8 = vld [vmem:[%s5148_s5 + $0x90] sm:$0xff] }
0x19e0   : > { %4046 = vmatprep.subr.bf16.mxu1 %v4045_v9  ;;  %v3437_v9 = vld [vmem:[%s5148_s5 + $0x98] sm:$0xff] }
0x1a5b   : > { %v2132_v13 = vpop.xlane.xlu1 %2131 }
0x1a5c   : > { %v2133_v14 = vmul.f32 0.03125, %v2132_v13  ;;  %v3382_v13 = vld [vmem:[%s5151_s8 + $0x14] ss:$0 sm:$0xff] }
0x1a5e   : > { %v4714_v15 = vsub.f32 %v2129_v7, %v2133_v14 }
0x1a60   : > { %v2135_v16 = vmul.f32 %v4714_v15, %v4714_v15 }
0x1a62   : > { %v2136_v17 = vsel %vm453_vm4, %v2135_v16, 0.0  ;;  %v3383_v16 = vld [vmem:[%s5151_s8 + $0x15] ss:$0 sm:$0xff] }
0x1a63   : > { %2137 = vadd.xlane.f32.xlu0 %v2136_v17 }
0x1af0   : > { %v2138_v10 = vpop.xlane.xlu0 %2137 }
0x1af1   : > { %v2139_v11 = vmul.f32 0.03125, %v2138_v10  ;;  %v4063_v10 = vpack.c.bf16 %v3437_v9, %v3436_v8 }
0x1af3   : > { %v2140_v7 = vadd.f32 1e-05, %v2139_v11  ;;  %v2392_v11 = vld [vmem:[%s5151_s8 + $0x19] sm:$0x1] }
0x1af5   : > { %4174 = vrsqrt.f32 %v2140_v7 }
0x1aff   : > { %v4175_v12 = vpop.eup %4174 }
0x1b00   : > { %v2142_v14 = vmul.f32 %v4175_v12, %v4714_v15  ;;  %v4047_v15 = vpack.c.bf16 %v3407_v20, %v3406_v19 }
0x1b02   : > { %v2148_v17 = vmul.f32 %v3382_v13, %v2142_v14  ;;  %4048 = vmatpush3.bf16.msra.mxu1 %v4047_v15  ;;  %v2472_v14 = vld [vmem:[%s5151_s8 + $0x1a] sm:$0x1] }
0x1b03   : > { %4050 = vmatprep.subr.bf16.mxu1 %v4049_v23  ;;  %v4138_v23 = vpack.i.bf16 %v3440_v22, %v3439_v21 }
0x1b04   : > { %v2154_v18 = vadd.f32 %v3383_v16, %v2148_v17 }
0x1b06   : > { %3393 = vmatmul.mubr.msk.f32.vlgmr.msra.gmra.mrb[26].mxu0 %vm453_vm4, %v2154_v18  ;;  %4052 = vmatpush3.bf16.msra.mxu1 %v4051_v26  ;;  %v3442_v26 = vld [vmem:[%s5147_s4 + $0x78] sm:$0xff] }
0x1b07   : > { %3856 = vmatprep.mubr.msk.f32.mxu0 %vm4197_vm1, %v4196_v1  ;;  %3892 = vmatprep.subr.mxu1 %v4196_v1  ;;  %v4143_v27 = vpack.i.bf16 %v3442_v26, %v3441_v25 }
0x1b08   : > { %4055 = vmatpush3.bf16.msra.mxu0 %v4054_v51 }
0x1b09   : > { %4056 = vmatprep.subr.bf16.mxu0 %v4198_v6  ;;  %4144 = vrot.lane.b32.xlu1 %v4143_v27, %s4200_s17 }
0x1b0c   : > { %4058 = vmatpush3.bf16.msra.mxu0 %v4057_v53 }
0x1b0d   : > { %4059 = vmatprep.subr.bf16.mxu0 %v4198_v6 }
0x1b7b   : > { %v4145_v49 = vpop.permute.xlu1 %4144 }
0x1b7c   : > { %v4147_v52 = vunpack.i.h.bf16 %v4145_v49  ;;  %v4146_v48 = vunpack.i.l.bf16 %v4145_v49  ;;  %v3481_v49 = vld [vmem:[%s5150_s7 + $0x280] sm:$0xff] }
0x1bd9   : > { %v2246_v30 = vpop.f32.mrb[26].mxu0 }
0x1bda   : > { %v2247_v31 = vadd.f32 %v2246_v30, %v2170_v28  ;;  %v2248_v32 = vpop.f32.mrb[27].mxu0  ;;  %v4069_v28 = vpack.c.bf16 %v3442_v26, %v3441_v25  ;;  %v2929_v26 = vld [vmem:[%s5151_s8 + $0x20] sm:$0x1] }
0x1bdb   : > { %v2249_v33 = vadd.f32 %v2248_v32, %v2174_v29 }
0x1bdc   : > { %v2251_v35 = vmax.f32 %v2247_v31, 0.0 }
0x1bdd   : > { %v2252_v34 = vmax.f32 %v2249_v33, 0.0 }
0x1bdf   : > { %2355 = vmatprep.mubr.f32.mxu1 %v2252_v34  ;;  %v3446_v34 = vld [vmem:[%s5151_s8 + $0x1f] ss:$0 sm:$0xff] }
0x1be0   : > { %2356 = vmatmul.mubr.f32.vlgmr.msra.gmra.mrb[12].mxu1 %v2251_v35  ;;  %2754 = vrot.lane.b32.xlu1 %v3446_v34, %s4199_s21  ;;  %s352_s21 = scalar_lea.vmem %s5153_s10, %s5155_s14 }
0x1be1   : > { %3894 = vmatprep.mubr.msk.f32.mxu1 %vm4197_vm1, %v4196_v1 }
0x1c52   : > { %v2755_v8 = vpop.permute.xlu1 %2754 }
0x1cb3   : > { %v3632_v36 = vpop.f32.mrb[12].mxu1 }
0x1cb4   : > { %v3633_v38 = vpop.f32.mrb[13].mxu1 }
0x1cb5   : > { %v3634_v39 = vadd.f32 %v3633_v38, %v3632_v36  ;;  %v2564_v38 = vld [vmem:[%s5151_s8 + $0x1b] sm:$0x1] }
0x1cb7   : > { %v2358_v40 = vadd.f32 %v3634_v39, %v3426_v37  ;;  %v2569_v39 = vld [vmem:[%s5151_s8 + $0x1c] sm:$0x1] }
0x1cb9   : > { %v2361_v41 = vadd.f32 %v2358_v40, %v2154_v18  ;;  %v2566_v40 = vrot.slane %v2564_v38, 1 }
0x1cbb   : > { %v2362_v42 = vsel %vm453_vm4, %v2361_v41, 0.0 }
0x1cbc   : > { %2363 = vadd.xlane.f32.xlu0 %v2362_v42 }
0x1d49   : > { %v2364_v43 = vpop.xlane.xlu0 %2363 }
0x1d4a   : > { %v2365_v44 = vmul.f32 0.03125, %v2364_v43 }
0x1d4c   : > { %v2366_v45 = vsub.f32 %v2361_v41, %v2365_v44  ;;  %v2571_v44 = vrot.slane %v2569_v39, 1  ;;  %v3455_v39 = vld [vmem:[%s5149_s6 + $0x80] sm:$0xff] }
0x1d4e   : > { %v2367_v46 = vmul.f32 %v2366_v45, %v2366_v45 }
0x1d50   : > { %v2368_v47 = vsel %vm453_vm4, %v2367_v46, 0.0 }
0x1d51   : > { %2369 = vadd.xlane.f32.xlu0 %v2368_v47 }
0x1dde   : > { %v2370_v54 = vpop.xlane.xlu0 %2369 }
0x1ddf   : > { %v2371_v55 = vmul.f32 0.03125, %v2370_v54  ;;  %v4075_v54 = vpack.c.bf16 %v4147_v52, %v4146_v48  ;;  %v3466_v48 = vld [vmem:[%s5150_s7 + $0x208] sm:$0xff] }
0x1de1   : > { %v2372_v56 = vadd.f32 1e-05, %v2371_v55 }
0x1de3   : > { %4176 = vrsqrt.f32 %v2372_v56 }
0x1ded   : > { %v4177_v57 = vpop.eup %4176 }
0x1dee   : > { %v2374_v60 = vmul.f32 %v4177_v57, %v2366_v45  ;;  %v3445_v57 = vld [vmem:[%s5151_s8 + $0x1e] ss:$0 sm:$0xff] }
0x1df0   : > { %v2380_v63 = vmul.f32 %v3427_v58, %v2374_v60  ;;  %v2579_v60 = vld [vmem:[%s5151_s8 + $0x1d] sm:$0x1] }
0x1df2   : > { %v4889_v3 = vadd.f32 %v3428_v62, %v2380_v63 }
0x1df4   : > { %v2394_v5 = vrot.slane %v4889_v3, 7 }
0x1df6   : > { %3857 = vmatmul.mubr.msk.f32.vlgmr.msra.gmra.mrb[28].mxu0 %vm453_vm4, %v2394_v5 }
0x1df7   : > { %4061 = vmatpush3.bf16.msra.mxu0 %v4060_v4  ;;  %3867 = vmatprep.mubr.msk.f32.mxu0 %vm4197_vm1, %v4196_v1 }
0x1df8   : > { %4062 = vmatprep.subr.bf16.mxu0 %v4198_v6 }
0x1dfb   : > { %4064 = vmatpush3.bf16.msra.mxu0 %v4063_v10 }
0x1dfc   : > { %4065 = vmatprep.subr.bf16.mxu0 %v4198_v6 }
0x1ec9   : > { %v2463_v7 = vpop.f32.mrb[28].mxu0 }
0x1eca   : > { %v2464_v12 = vadd.f32 %v2463_v7, %v2392_v11  ;;  %v3858_v13 = vpop.f32.mrb[29].mxu0 }
0x1ecc   : > { %3868 = vmatmul.mubr.msk.f32.vlgmr.msra.gmra.mrb[30].mxu0 %vm453_vm4, %v2464_v12 }
0x1ecd   : > { %3878 = vmatprep.mubr.msk.f32.mxu0 %vm4197_vm1, %v4196_v1  ;;  %4067 = vmatpush3.bf16.msra.mxu0 %v4066_v24 }
0x1ece   : > { %4068 = vmatprep.subr.bf16.mxu0 %v4198_v6 }
0x1ed1   : > { %4070 = vmatpush3.bf16.msra.mxu0 %v4069_v28 }
0x1ed2   : > { %4071 = vmatprep.subr.bf16.mxu0 %v4198_v6 }
0x1f9f   : > { %v2542_v16 = vpop.f32.mrb[30].mxu0 }
0x1fa0   : > { %v2543_v17 = vadd.f32 %v2542_v16, %v2472_v14  ;;  %v3869_v18 = vpop.f32.mrb[31].mxu0  ;;  %v3450_v16 = vld [vmem:[%s5148_s5 + $0xa0] sm:$0xff] }
0x1fa1   : > { %v3452_v18 = vld [vmem:[%s5148_s5 + $0xb0] sm:$0xff] }
0x1fa2   : > { %v2547_v19 = vrot.slane %v2543_v17, 1  ;;  %v3451_v17 = vld [vmem:[%s5148_s5 + $0xa8] sm:$0xff] }
0x1fa4   : > { %v2549_v20 = vadd.f32 %v2547_v19, %v4889_v3  ;;  %v4078_v19 = vpack.c.bf16 %v3451_v17, %v3450_v16  ;;  %v3473_v16 = vld [vmem:[%s5150_s7 + $0x240] sm:$0xff]  ;;  %v3474_v17 = vld [vmem:[%s5150_s7 + $0x248] sm:$0xff] }
0x1fa6   : > { %v2551_v15 = vsel %vm2550_vm8, %v2549_v20, 0.0 }
0x1fa7   : > { %2552 = vadd.xlane.f32.xlu0 %v2551_v15 }
0x2034   : > { %v2553_v29 = vpop.xlane.xlu0 %2552 }
0x2035   : > { %v2554_v30 = vmul.f32 0.03125, %v2553_v29 }
0x2037   : > { %v2555_v31 = vsub.f32 %v2549_v20, %v2554_v30  ;;  %v3453_v20 = vld [vmem:[%s5148_s5 + $0xb8] sm:$0xff] }
0x2038   : > { %v4081_v15 = vpack.c.bf16 %v3453_v20, %v3452_v18  ;;  %v3491_v18 = vld [vmem:[%s5150_s7 + $0x2d0] sm:$0xff]  ;;  %v4109_v20 = vpack.c.bf16 %v3474_v17, %v3473_v16 }
0x2039   : > { %v2556_v32 = vmul.f32 %v2555_v31, %v2555_v31 }
0x203b   : > { %v2557_v33 = vsel %vm2550_vm8, %v2556_v32, 0.0 }
0x203c   : > { %2558 = vadd.xlane.f32.xlu0 %v2557_v33 }
0x2052   : > { %4139 = vrot.lane.b32.xlu0 %v4138_v23, %s4200_s17 }
0x20c9   : > { %v2559_v35 = vpop.xlane.xlu0 %2558 }
0x20ca   : > { %v2560_v36 = vmul.f32 0.03125, %v2559_v35 }
0x20cc   : > { %v2561_v37 = vadd.f32 1e-05, %v2560_v36  ;;  %v3456_v36 = vld [vmem:[%s5149_s6 + $0x88] sm:$0xff] }
0x20cd   : > { %v4140_v41 = vpop.permute.xlu0 %4139 }
0x20ce   : > { %4178 = vrsqrt.f32 %v2561_v37  ;;  %v4142_v45 = vunpack.i.h.bf16 %v4140_v41  ;;  %v4141_v46 = vunpack.i.l.bf16 %v4140_v41  ;;  %v3458_v37 = vld [vmem:[%s5149_s6 + $0x98] sm:$0xff] }
0x20cf   : > { %v4083_v38 = vpack.c.bf16 %v3458_v37, %v3456_v36 }
0x20d0   : > { %v4072_v51 = vpack.c.bf16 %v4142_v45, %v4141_v46  ;;  %v3459_v45 = vld [vmem:[%s5149_s6 + $0xa0] sm:$0xff]  ;;  %v3461_v46 = vld [vmem:[%s5149_s6 + $0xb0] sm:$0xff] }
0x20d8   : > { %v4179_v42 = vpop.eup %4178 }
0x20d9   : > { %v2563_v43 = vmul.f32 %v4179_v42, %v2555_v31  ;;  %v3460_v42 = vld [vmem:[%s5149_s6 + $0xa8] sm:$0xff] }
0x20db   : > { %v2568_v47 = vmul.f32 %v2566_v40, %v2563_v43  ;;  %v3457_v40 = vld [vmem:[%s5149_s6 + $0x90] sm:$0xff]  ;;  %v3462_v43 = vld [vmem:[%s5149_s6 + $0xb8] sm:$0xff] }
0x20dc   : > { %v4085_v41 = vpack.c.bf16 %v3457_v40, %v3455_v39  ;;  %v3478_v39 = vld [vmem:[%s5150_s7 + $0x268] sm:$0xff] }
0x20dd   : > { %v4941_v50 = vadd.f32 %v2571_v44, %v2568_v47  ;;  %v4087_v44 = vpack.c.bf16 %v3462_v43, %v3460_v42  ;;  %v4089_v47 = vpack.c.bf16 %v3461_v46, %v3459_v45  ;;  %v3479_v43 = vld [vmem:[%s5150_s7 + $0x270] sm:$0xff]  ;;  %v3463_v46 = vld [vmem:[%s5152_s9 + $0x2] ss:$4 sm:$0x3] }
0x20df   : > { %v2581_v53 = vrot.slane %v4941_v50, 7 }
0x20e1   : > { %3879 = vmatmul.mubr.msk.f32.vlgmr.msra.gmra.mrb[32].mxu0 %vm453_vm4, %v2581_v53  ;;  %v3483_v53 = vld [vmem:[%s5150_s7 + $0x290] sm:$0xff] }
0x20e2   : > { %4073 = vmatpush3.bf16.msra.mxu0 %v4072_v51  ;;  %3889 = vmatprep.mubr.msk.f32.mxu0 %vm4197_vm1, %v4196_v1  ;;  %v3465_v51 = vld [vmem:[%s5150_s7 + $0x200] sm:$0xff] }
0x20e3   : > { %4074 = vmatprep.subr.bf16.mxu0 %v4198_v6 }
0x20e6   : > { %4076 = vmatpush3.bf16.msra.mxu0 %v4075_v54  ;;  %v3484_v54 = vld [vmem:[%s5150_s7 + $0x298] sm:$0xff] }
0x20e7   : > { %3897 = vmatprep.subr.mxu0 %v4196_v1 }
0x20e9   : > { %3890 = vmatmul.mubr.msk.f32.vlgmr.msra.gmra.mrb[34].mxu0 %vm453_vm4, %v4889_v3 }
0x20ea   : > { %3899 = vmatprep.mubr.msk.f32.mxu0 %vm4197_vm1, %v4196_v1 }
0x21b4   : > { %v2650_v55 = vpop.f32.mrb[32].mxu0 }
0x21b5   : > { %v3880_v56 = vpop.f32.mrb[33].mxu0  ;;  %v2651_v0 = vadd.f32 %v2650_v55, %v2579_v60  ;;  %v4093_v55 = vpack.c.bf16 %v3466_v48, %v3465_v51  ;;  %v3485_v60 = vld [vmem:[%s5150_s7 + $0x2a0] sm:$0xff] }
0x21b6   : > { %v4095_v56 = vpack.c.bf16 %v3484_v54, %v3483_v53 }
0x21bc   : > { %v2738_v58 = vpop.f32.mrb[34].mxu0 }
0x21bd   : > { %v2747_v62 = vadd.f32 %v3445_v57, %v2738_v58  ;;  %v3891_v63 = vpop.f32.mrb[35].mxu0  ;;  %v2757_v9 = vadd.f32 %v2755_v8, %v2738_v58  ;;  %v3467_v57 = vld [vmem:[%s5150_s7 + $0x210] sm:$0xff]  ;;  %v3468_v58 = vld [vmem:[%s5150_s7 + $0x218] sm:$0xff] }
0x21be   : > { %v4097_v63 = vpack.c.bf16 %v3468_v58, %v3467_v57 }
0x21bf   : > { %3893 = vmatpush3.xpose.msk.msra.mxu1 %vm453_vm4, %v2747_v62  ;;  %v3486_v62 = vld [vmem:[%s5150_s7 + $0x2a8] sm:$0xff] }
0x21c0   : > { %4077 = vmatprep.subr.bf16.mxu1 %v4198_v6 }
0x21c2   : > { %3895 = vmatmul.mubr.msk.f32.vlgmr.msra.gmra.mrb[14].mxu1 %vm453_vm4, %v2651_v0  ;;  %v4099_v0 = vpack.c.bf16 %v3486_v62, %v3485_v60 }
0x21c3   : > { %3910 = vmatprep.mubr.msk.f32.mxu1 %vm4197_vm1, %v4196_v1  ;;  %4079 = vmatpush3.bf16.msra.mxu1 %v4078_v19  ;;  %v3492_v19 = vld [vmem:[%s5150_s7 + $0x2d8] sm:$0xff] }
0x21c4   : > { %4080 = vmatprep.subr.bf16.mxu1 %v4198_v6 }
0x21c7   : > { %4082 = vmatpush3.bf16.msra.mxu1 %v4081_v15  ;;  %v4111_v15 = vpack.c.bf16 %v3492_v19, %v3491_v18 }
0x2295   : > { %v2830_v2 = vpop.f32.mrb[14].mxu1 }
0x2296   : > { %v2834_v3 = vmul.f32 0.17677669, %v2830_v2  ;;  %v3896_v4 = vpop.f32.mrb[15].mxu1  ;;  %v3469_v2 = vld [vmem:[%s5150_s7 + $0x220] sm:$0xff] }
0x2297   : > { %v3487_v4 = vld [vmem:[%s5150_s7 + $0x2b0] sm:$0xff] }
0x2298   : > { %v2836_v5 = vsel %vm2835_vm9, %v2834_v3, -inf }
0x2299   : > { %2837 = vmax.xlane.f32.xlu0 %v2836_v5  ;;  %v3488_v5 = vld [vmem:[%s5150_s7 + $0x2b8] sm:$0xff] }
0x22af   : > { %2848 = vrot.lane.b32.xlu0 %v2757_v9, %s4200_s17  ;;  %v4103_v9 = vpack.c.bf16 %v3488_v5, %v3487_v4 }
0x2326   : > { %v2838_v10 = vpop.xlane.xlu0 %2837 }
0x2327   : > { %v2839_v11 = vsub.f32 %v2834_v3, %v2838_v10  ;;  %v3470_v3 = vld [vmem:[%s5150_s7 + $0x228] sm:$0xff]  ;;  %v3471_v10 = vld [vmem:[%s5150_s7 + $0x230] sm:$0xff] }
0x2328   : > { %v4101_v8 = vpack.c.bf16 %v3470_v3, %v3469_v2 }
0x2329   : > { %v2840_v7 = vmul.f32 1.442695, %v2839_v11  ;;  %v3472_v11 = vld [vmem:[%s5150_s7 + $0x238] sm:$0xff] }
0x232a   : > { %v2849_v12 = vpop.permute.xlu0 %2848 }
0x232b   : > { %4180 = vpow2.f32 %v2840_v7  ;;  %3898 = vmatpush3.msra.mxu0 %v2849_v12  ;;  %v3489_v7 = vld [vmem:[%s5150_s7 + $0x2c0] sm:$0xff]  ;;  %v3490_v12 = vld [vmem:[%s5150_s7 + $0x2c8] sm:$0xff] }
0x232c   : > { %4084 = vmatprep.subr.bf16.mxu0 %v4083_v38  ;;  %v3477_v38 = vld [vmem:[%s5150_s7 + $0x260] sm:$0xff] }
0x232d   : > { %v4117_v40 = vpack.c.bf16 %v3478_v39, %v3477_v38 }
0x2335   : > { %v4181_v13 = vpop.eup %4180 }
0x2336   : > { %v2842_v14 = vsel %vm2835_vm9, %v4181_v13, 0.0 }
0x2337   : > { %2843 = vadd.xlane.f32.xlu1 %v2842_v14  ;;  %v4107_v14 = vpack.c.bf16 %v3490_v12, %v3489_v7 }
0x23c4   : > { %v2844_v21 = vpop.xlane.xlu1 %2843 }
0x23c5   : > { %4182 = vrcp.f32 %v2844_v21  ;;  %v3475_v21 = vld [vmem:[%s5150_s7 + $0x250] sm:$0xff] }
0x23cf   : > { %v4183_v22 = vpop.eup %4182 }
0x23d0   : > { %v2846_v23 = vmul.f32 %v4183_v22, %v4181_v13  ;;  %v4105_v13 = vpack.c.bf16 %v3472_v11, %v3471_v10  ;;  %v3476_v22 = vld [vmem:[%s5150_s7 + $0x258] sm:$0xff]  ;;  %v3250_v10 = vld [vmem:[%s5151_s8 + $0x24] sm:$0x1]  ;;  %v3255_v11 = vld [vmem:[%s5151_s8 + $0x25] sm:$0x1] }
0x23d1   : > { %v3252_v7 = vrot.slane %v3250_v10, 1 }
0x23d2   : > { %3900 = vmatmul.mubr.msk.f32.vlgmr.msra.gmra.mrb[36].mxu0 %vm824_vm7, %v2846_v23  ;;  %v3493_v23 = vld [vmem:[%s5150_s7 + $0x2e0] sm:$0xff] }
0x23d3   : > { %3120 = vmatprep.mubr.f32.mxu0 %v4196_v1  ;;  %4086 = vmatpush1.bf16.msra.mxu0 %v4085_v41  ;;  %v3496_v41 = vld [vmem:[%s5150_s7 + $0x2f8] sm:$0xff] }
0x23d4   : > { %4088 = vmatprep.subr.bf16.mxu0 %v4087_v44  ;;  %v3480_v44 = vld [vmem:[%s5150_s7 + $0x278] sm:$0xff] }
0x23d5   : > { %v4121_v45 = vpack.c.bf16 %v3480_v44, %v3479_v43 }
0x23d7   : > { %4090 = vmatpush1.bf16.msra.mxu0 %v4089_v47  ;;  %v3047_v47 = vrot.slane %v3463_v46, %v4633_v59 }
0x24a5   : > { %v2920_v24 = vpop.f32.mrb[36].mxu0 }
0x24a6   : > { %v3901_v25 = vpop.f32.mrb[37].mxu0  ;;  %3911 = vmatmul.mubr.msk.f32.vlgmr.msra.gmra.mrb[16].mxu1 %vm453_vm4, %v2920_v24  ;;  %v3494_v24 = vld [vmem:[%s5150_s7 + $0x2e8] sm:$0xff] }
0x24a7   : > { %v4113_v25 = vpack.c.bf16 %v3476_v22, %v3475_v21 }
0x2579   : > { %v2999_v27 = vpop.f32.mrb[16].mxu1 }
0x257a   : > { %v3000_v28 = vadd.f32 %v2999_v27, %v2929_v26  ;;  %v3912_v6 = vpop.f32.mrb[17].mxu1  ;;  %v4115_v26 = vpack.c.bf16 %v3494_v24, %v3493_v23 }
0x257c   : > { %v3004_v29 = vrot.slane %v3000_v28, 1 }
0x257e   : > { %v3006_v30 = vadd.f32 %v3004_v29, %v4941_v50  ;;  %v3482_v50 = vld [vmem:[%s5150_s7 + $0x288] sm:$0xff]  ;;  %v3020_v29 = vld [vmem:[%s5151_s8 + $0x21] sm:$0x1] }
0x257f   : > { %v4091_v52 = vpack.c.bf16 %v3482_v50, %v3481_v49  ;;  %v3051_v49 = vrot.slane %v3463_v46, %v4639_v61 }
0x2580   : > { %v3007_v31 = vsel %vm2550_vm8, %v3006_v30, 0.0 }
0x2581   : > { %3008 = vadd.xlane.f32.xlu1 %v3007_v31  ;;  %4092 = vmatprep.subr.bf16.mxu1 %v4091_v52  ;;  %v3022_v31 = vrot.slane %v3020_v29, 1 }
0x2582   : > { %4094 = vmatpush3.bf16.msra.mxu1 %v4093_v55 }
0x2583   : > { %4096 = vmatprep.subr.bf16.mxu1 %v4095_v56  ;;  %v3162_v56 = vld [vmem:[%s5151_s8 + $0x23] sm:$0x1] }
0x2586   : > { %4098 = vmatpush3.bf16.msra.mxu1 %v4097_v63 }
0x2587   : > { %4100 = vmatprep.subr.bf16.mxu1 %v4099_v0 }
0x258a   : > { %4102 = vmatpush3.bf16.msra.mxu1 %v4101_v8 }
0x258b   : > { %4104 = vmatprep.subr.bf16.mxu1 %v4103_v9 }
0x258e   : > { %4106 = vmatpush3.bf16.msra.mxu1 %v4105_v13  ;;  %v3257_v13 = vrot.slane %v3255_v11, 1 }
0x258f   : > { %4108 = vmatprep.subr.bf16.mxu1 %v4107_v14 }
0x2592   : > { %4110 = vmatpush3.bf16.msra.mxu1 %v4109_v20 }
0x2593   : > { %4112 = vmatprep.subr.bf16.mxu1 %v4111_v15 }
0x2596   : > { %4114 = vmatpush3.bf16.msra.mxu1 %v4113_v25 }
0x2597   : > { %4116 = vmatprep.subr.bf16.mxu1 %v4115_v26 }
0x259a   : > { %4118 = vmatpush3.bf16.msra.mxu1 %v4117_v40 }
0x260e   : > { %v3009_v32 = vpop.xlane.xlu1 %3008 }
0x260f   : > { %v3010_v33 = vmul.f32 0.03125, %v3009_v32 }
0x2611   : > { %v4986_v1 = vsub.f32 %v3006_v30, %v3010_v33  ;;  %v3025_v30 = vld [vmem:[%s5151_s8 + $0x22] sm:$0x1] }
0x2613   : > { %v3012_v34 = vmul.f32 %v4986_v1, %v4986_v1 }
0x2615   : > { %v3013_v35 = vsel %vm2550_vm8, %v3012_v34, 0.0  ;;  %v3027_v34 = vrot.slane %v3025_v30, 1 }
0x2616   : > { %3014 = vadd.xlane.f32.xlu1 %v3013_v35 }
0x26a3   : > { %v3015_v27 = vpop.xlane.xlu1 %3014 }
0x26a4   : > { %v3016_v28 = vmul.f32 0.03125, %v3015_v27 }
0x26a6   : > { %v3017_v6 = vadd.f32 1e-05, %v3016_v28 }
0x26a8   : > { %4184 = vrsqrt.f32 %v3017_v6 }
0x26b2   : > { %v4185_v32 = vpop.eup %4184 }
0x26b3   : > { %v3019_v33 = vmul.f32 %v4185_v32, %v4986_v1  ;;  %v3495_v1 = vld [vmem:[%s5150_s7 + $0x2f0] sm:$0xff] }
0x26b4   : > { %v4119_v42 = vpack.c.bf16 %v3496_v41, %v3495_v1 }
0x26b5   : > { %v3024_v35 = vmul.f32 %v3022_v31, %v3019_v33 }
0x26b6   : > { %4120 = vmatprep.subr.bf16.mxu1 %v4119_v42 }
0x26b7   : > { %v3029_v36 = vadd.f32 %v3027_v34, %v3024_v35  ;;  %4122 = vmatpush3.bf16.msra.mxu1 %v4121_v45 }
0x26b9   : > { %v3042_v37 = vrot.slane %v3029_v36, 7 }
0x26bb   : > { %3464 = vmatmul.mubr.msk.f32.vlgmr.msra.gmra.mrb[38].mxu0 %vm453_vm4, %v3042_v37 }
0x278e   : > { %v3122_v50 = vpop.f32.mrb[38].mxu0 }
0x278f   : > { %v3123_v51 = vadd.f32 %v3122_v50, %v3047_v47  ;;  %v3124_v52 = vpop.f32.mrb[39].mxu0 }
0x2790   : > { %v3125_v48 = vadd.f32 %v3124_v52, %v3051_v49 }
0x2791   : > { %v3127_v54 = vmax.f32 %v3123_v51, 0.0 }
0x2792   : > { %v3128_v53 = vmax.f32 %v3125_v48, 0.0 }
0x2794   : > { %3227 = vmatprep.mubr.f32.mxu1 %v3128_v53 }
0x2795   : > { %3228 = vmatmul.mubr.f32.vlgmr.msra.gmra.mrb[18].mxu1 %v3127_v54 }
0x2868   : > { %v3696_v55 = vpop.f32.mrb[18].mxu1 }
0x2869   : > { %v3697_v57 = vpop.f32.mrb[19].mxu1 }
0x286a   : > { %v3698_v58 = vadd.f32 %v3697_v57, %v3696_v55 }
0x286c   : > { %v3230_v60 = vadd.f32 %v3698_v58, %v3162_v56 }
0x286e   : > { %v3234_v62 = vrot.slane %v3230_v60, 1 }
0x2870   : > { %v3236_v59 = vadd.f32 %v3234_v62, %v3029_v36 }
0x2872   : > { %v3237_v61 = vsel %vm2550_vm8, %v3236_v59, 0.0 }
0x2873   : > { %3238 = vadd.xlane.f32.xlu0 %v3237_v61 }
0x2900   : > { %v3239_v63 = vpop.xlane.xlu0 %3238 }
0x2901   : > { %v3240_v0 = vmul.f32 0.03125, %v3239_v63 }
0x2903   : > { %v3241_v2 = vsub.f32 %v3236_v59, %v3240_v0 }
0x2905   : > { %v3242_v3 = vmul.f32 %v3241_v2, %v3241_v2 }
0x2907   : > { %v3243_v4 = vsel %vm2550_vm8, %v3242_v3, 0.0 }
0x2908   : > { %3244 = vadd.xlane.f32.xlu1 %v3243_v4 }
0x2995   : > { %v3245_v5 = vpop.xlane.xlu1 %3244 }
0x2996   : > { %v3246_v8 = vmul.f32 0.03125, %v3245_v5 }
0x2998   : > { %v3247_v9 = vadd.f32 1e-05, %v3246_v8 }
0x299a   : > { %4186 = vrsqrt.f32 %v3247_v9 }
0x29a4   : > { %v4187_v12 = vpop.eup %4186 }
0x29a5   : > { %v3249_v14 = vmul.f32 %v4187_v12, %v3241_v2 }
0x29a7   : > { %v3254_v16 = vmul.f32 %v3252_v7, %v3249_v14 }
0x29a9   : > { %v3259_v17 = vadd.f32 %v3257_v13, %v3254_v16 }
0x29ab   : > { %3260 = vst.msk [vmem:[%s352_s21 - $0x7] sm:$0x80] %vm2550_vm8, %v3259_v17 }
0x29ac PF: > { %s20_s13 = sadd.s32 1, %s4194_s13  }
0x29ad   : > { %p17_p4 = scmp.ge.s32.totalorder %s20_s13, 4  }
0x29af   :  { %19 = sbr.rel (!%p17_p4) target bundleno = 1 (0x1), region = 105 }

</bundles_post_ra>
